<compile_context>
chip_gen: v7x
topology: tpu7x:2x2x1
jax: 0.10.0
libtpu: 0.0.40
codegen_flags: <defaults>
</compile_context>

<pallas_src>
import functools

import jax
import jax.numpy as jnp
from jax import lax
from jax.experimental import pallas as pl
from jax.experimental.pallas import tpu as pltpu

# 32 MiB scoped VMEM: fits double-buffered 256x256 bf16 tiles with large margin
# and is safe on every generation (v5e/v6e 128 MiB physical, v7x 64 MiB).
VMEM_LIMIT_BYTES = 32 * 1024 * 1024

# Default tile sizes chosen for the v7x 64 MiB VMEM budget (also fine on
# v5e/v6e): 256-aligned N/K to fill the 256-wide MXU, 128-multiple K for v5e.
MM_TM, MM_TN, MM_TK = 256, 256, 256
ATTN_BLOCK = 256


def _round_up(x, m):
    return (x + m - 1) // m * m


def _pad_to(a, shape):
    pads = [(0, t - s) for s, t in zip(a.shape, shape)]
    if all(p == (0, 0) for p in pads):
        return a
    return jnp.pad(a, pads)


# ----------------------------------------------------------------------------
# Tiled matmul with fused bias / GELU epilogue
# ----------------------------------------------------------------------------
def _matmul_kernel(x_ref, w_ref, b_ref, o_ref, acc_ref, *, activation):
    k = pl.program_id(2)

    @pl.when(k == 0)
    def _init():
        acc_ref[...] = jnp.zeros_like(acc_ref)

    acc_ref[...] += jnp.dot(
        x_ref[...], w_ref[...], preferred_element_type=jnp.float32
    )

    @pl.when(k == pl.num_programs(2) - 1)
    def _finalize():
        out = acc_ref[...] + b_ref[...]          # bias fused into the epilogue
        if activation == "gelu":
            out = jax.nn.gelu(out)               # fused GELU (EUP tanh path)
        o_ref[...] = out.astype(o_ref.dtype)


def pallas_matmul(x, w, bias=None, activation=None, out_dtype=jnp.bfloat16,
                  tm=MM_TM, tn=MM_TN, tk=MM_TK):
    """x: [M, K], w: [K, N] -> [M, N]; bf16 MXU inputs, f32 accumulation."""
    M, K = x.shape
    K2, N = w.shape
    assert K == K2
    # Use the full dim when it is smaller than the preferred tile (full-array
    # blocks satisfy the (8,128) rule); otherwise tile and pad to a multiple.
    tm = tm if M > tm else M
    tn = tn if N > tn else N
    tk = tk if K > tk else K
    Mp, Np, Kp = _round_up(M, tm), _round_up(N, tn), _round_up(K, tk)

    xp = _pad_to(x.astype(jnp.bfloat16), (Mp, Kp))
    wp = _pad_to(w.astype(jnp.bfloat16), (Kp, Np))
    if bias is None:
        bp = jnp.zeros((1, Np), jnp.float32)
    else:
        bp = _pad_to(bias.reshape(1, N).astype(jnp.float32), (1, Np))

    kern = functools.partial(_matmul_kernel, activation=activation)
    out = pl.pallas_call(
        kern,
        out_shape=jax.ShapeDtypeStruct((Mp, Np), out_dtype),
        grid=(Mp // tm, Np // tn, Kp // tk),
        in_specs=[
            pl.BlockSpec((tm, tk), lambda i, j, k: (i, k)),
            pl.BlockSpec((tk, tn), lambda i, j, k: (k, j)),
            pl.BlockSpec((1, tn), lambda i, j, k: (0, j)),
        ],
        out_specs=pl.BlockSpec((tm, tn), lambda i, j, k: (i, j)),
        scratch_shapes=[pltpu.VMEM((tm, tn), jnp.float32)],
        compiler_params=pltpu.CompilerParams(
            dimension_semantics=("parallel", "parallel", "arbitrary"),
            vmem_limit_bytes=VMEM_LIMIT_BYTES,
        ),
    )(xp, wp, bp)
    if (Mp, Np) != (M, N):
        out = out[:M, :N]
    return out


# ----------------------------------------------------------------------------
# Flash-style causal attention (online softmax, all heads of one batch / step)
# ----------------------------------------------------------------------------
def _flash_attn_kernel(q_ref, k_ref, v_ref, o_ref, m_ref, l_ref, acc_ref,
                       *, scale, bs):
    qi = pl.program_id(1)
    ki = pl.program_id(2)

    @pl.when(ki == 0)
    def _init():
        m_ref[...] = jnp.full_like(m_ref, -jnp.inf)
        l_ref[...] = jnp.zeros_like(l_ref)
        acc_ref[...] = jnp.zeros_like(acc_ref)

    # Causal: kv tiles strictly above the q tile are fully masked -> skip them.
    @pl.when(ki <= qi)
    def _update():
        q = q_ref[0] * scale                              # [H, bs, dh] bf16
        s = jnp.einsum("hqd,hkd->hqk", q, k_ref[0],
                       preferred_element_type=jnp.float32)  # [H, bs, bs]
        row = qi * bs + lax.broadcasted_iota(jnp.int32, s.shape, 1)
        col = ki * bs + lax.broadcasted_iota(jnp.int32, s.shape, 2)
        s = jnp.where(col <= row, s, jnp.float32(-1e30))
        m_prev = m_ref[...]
        m_new = jnp.maximum(m_prev, jnp.max(s, axis=-1, keepdims=True))
        alpha = jnp.exp(m_prev - m_new)
        p = jnp.exp(s - m_new)
        l_ref[...] = alpha * l_ref[...] + jnp.sum(p, axis=-1, keepdims=True)
        acc_ref[...] = alpha * acc_ref[...] + jnp.einsum(
            "hqk,hkd->hqd", p.astype(v_ref.dtype), v_ref[0],
            preferred_element_type=jnp.float32)
        m_ref[...] = m_new

    @pl.when(ki == pl.num_programs(2) - 1)
    def _finalize():
        inv_l = pl.reciprocal(l_ref[...], approx=True)
        o_ref[0] = (acc_ref[...] * inv_l).astype(o_ref.dtype)


def pallas_causal_attention(q, k, v, *, block=ATTN_BLOCK):
    """q, k, v: [B, H, S, dh] (bf16) -> [B, H, S, dh], causal attention."""
    B, H, S, dh = q.shape
    bs = block if S > block else S
    Sp = _round_up(S, bs)
    if Sp != S:
        pad = [(0, 0), (0, 0), (0, Sp - S), (0, 0)]
        q, k, v = (jnp.pad(t, pad) for t in (q, k, v))

    scale = float(dh) ** -0.5
    kern = functools.partial(_flash_attn_kernel, scale=scale, bs=bs)
    out = pl.pallas_call(
        kern,
        out_shape=jax.ShapeDtypeStruct((B, H, Sp, dh), q.dtype),
        grid=(B, Sp // bs, Sp // bs),
        in_specs=[
            pl.BlockSpec((1, H, bs, dh), lambda b, qi, ki: (b, 0, qi, 0)),
            # Clamp skipped (fully-masked) kv tiles to the diagonal tile so the
            # pipeline does not issue new DMAs for tiles whose compute we skip.
            pl.BlockSpec((1, H, bs, dh),
                         lambda b, qi, ki: (b, 0, jnp.minimum(ki, qi), 0)),
            pl.BlockSpec((1, H, bs, dh),
                         lambda b, qi, ki: (b, 0, jnp.minimum(ki, qi), 0)),
        ],
        out_specs=pl.BlockSpec((1, H, bs, dh), lambda b, qi, ki: (b, 0, qi, 0)),
        scratch_shapes=[
            pltpu.VMEM((H, bs, 1), jnp.float32),   # running max
            pltpu.VMEM((H, bs, 1), jnp.float32),   # running denominator
            pltpu.VMEM((H, bs, dh), jnp.float32),  # output accumulator
        ],
        compiler_params=pltpu.CompilerParams(
            dimension_semantics=("parallel", "parallel", "arbitrary"),
            vmem_limit_bytes=VMEM_LIMIT_BYTES,
        ),
    )(q, k, v)
    if Sp != S:
        out = out[:, :, :S, :]
    return out


# ----------------------------------------------------------------------------
# Row-tiled shifted cross-entropy (ignore_index = 0)
# ----------------------------------------------------------------------------
def _ce_kernel(logits_ref, labels_ref, loss_ref, cnt_ref):
    i = pl.program_id(0)

    @pl.when(i == 0)
    def _init():
        loss_ref[...] = jnp.zeros_like(loss_ref)
        cnt_ref[...] = jnp.zeros_like(cnt_ref)

    logits = logits_ref[...].astype(jnp.float32)          # [tr, V]
    labels = labels_ref[...]                              # [tr, 1] int32
    m = jnp.max(logits, axis=-1, keepdims=True)
    lse = jnp.log(jnp.sum(jnp.exp(logits - m), axis=-1, keepdims=True)) + m
    vocab_iota = lax.broadcasted_iota(jnp.int32, logits.shape, 1)
    picked = jnp.sum(jnp.where(vocab_iota == labels, logits, 0.0),
                     axis=-1, keepdims=True)
    valid = (labels != 0).astype(jnp.float32)             # ignore_index = 0
    loss_ref[...] += jnp.sum((lse - picked) * valid)
    cnt_ref[...] += jnp.sum(valid)


def pallas_shifted_cross_entropy(shift_logits, shift_labels):
    """shift_logits: [N, V] f32, shift_labels: [N] int -> mean NLL ignoring 0."""
    # TODO(synk): fuse this reduction into the lm_head matmul epilogue so the
    # [N, V] logits never round-trip through HBM when labels are provided.
    N, V = shift_logits.shape
    # Keep each (rows, V) f32 block around <=2 MiB so double-buffering fits.
    tr = max(8, min(256, (2 * 1024 * 1024) // max(V * 4, 1)))
    tr = max(8, (tr // 8) * 8)
    tr = min(tr, _round_up(N, 8))
    Np = _round_up(N, tr)
    logits_p = _pad_to(shift_logits.astype(jnp.float32), (Np, V))
    labels_p = _pad_to(shift_labels.reshape(N, 1).astype(jnp.int32), (Np, 1))

    loss_sum, cnt = pl.pallas_call(
        _ce_kernel,
        out_shape=(jax.ShapeDtypeStruct((1, 1), jnp.float32),
                   jax.ShapeDtypeStruct((1, 1), jnp.float32)),
        grid=(Np // tr,),
        in_specs=[
            pl.BlockSpec((tr, V), lambda i: (i, 0)),
            pl.BlockSpec((tr, 1), lambda i: (i, 0)),
        ],
        out_specs=(
            pl.BlockSpec((1, 1), lambda i: (0, 0)),
            pl.BlockSpec((1, 1), lambda i: (0, 0)),
        ),
        compiler_params=pltpu.CompilerParams(
            dimension_semantics=("arbitrary",),
            vmem_limit_bytes=VMEM_LIMIT_BYTES,
        ),
    )(logits_p, labels_p)
    return loss_sum[0, 0] / jnp.maximum(cnt[0, 0], 1.0)


# ----------------------------------------------------------------------------
# Model glue (plain JAX)
# ----------------------------------------------------------------------------
def layer_norm(x, g, b, eps=1e-5):
    xf = x.astype(jnp.float32)
    mu = jnp.mean(xf, axis=-1, keepdims=True)
    var = jnp.mean((xf - mu) ** 2, axis=-1, keepdims=True)
    y = (xf - mu) * lax.rsqrt(var + eps) * g + b
    return y.astype(jnp.bfloat16)


def init_params(key, num_tokens, dim, depth, max_seq_len, heads):
    ks = iter(jax.random.split(key, 4 + depth * 8))

    def w(k, shape, s=0.02):
        return (jax.random.normal(k, shape, jnp.float32) * s).astype(jnp.bfloat16)

    params = {
        "tok_emb": w(next(ks), (num_tokens, dim)),
        "pos_emb": w(next(ks), (max_seq_len, dim)),
        "norm_g": jnp.ones((dim,), jnp.float32),
        "norm_b": jnp.zeros((dim,), jnp.float32),
        "lm_head": w(next(ks), (dim, num_tokens)),
        "layers": [],
    }
    for _ in range(depth):
        params["layers"].append({
            "ln1_g": jnp.ones((dim,), jnp.float32),
            "ln1_b": jnp.zeros((dim,), jnp.float32),
            "w_qkv": w(next(ks), (dim, 3 * dim)),
            "w_o": w(next(ks), (dim, dim)),
            "ln2_g": jnp.ones((dim,), jnp.float32),
            "ln2_b": jnp.zeros((dim,), jnp.float32),
            "w_ff1": w(next(ks), (dim, 4 * dim)),
            "b_ff1": jnp.zeros((4 * dim,), jnp.float32),
            "w_ff2": w(next(ks), (4 * dim, dim)),
            "b_ff2": jnp.zeros((dim,), jnp.float32),
        })
    return params


def attention_block(layer, x, heads):
    B, S, D = x.shape
    dh = D // heads
    qkv = pallas_matmul(x.reshape(B * S, D), layer["w_qkv"])        # [B*S, 3D]
    # TODO(synk): express the q/k/v split and head grouping directly in the
    # attention BlockSpec index_map to remove this transpose's HBM round trip.
    qkv = qkv.reshape(B, S, 3, heads, dh).transpose(2, 0, 3, 1, 4)  # [3,B,H,S,dh]
    o = pallas_causal_attention(qkv[0], qkv[1], qkv[2])             # [B,H,S,dh]
    o = o.transpose(0, 2, 1, 3).reshape(B * S, D)
    return pallas_matmul(o, layer["w_o"]).reshape(B, S, D)


def ff_block(layer, x):
    B, S, D = x.shape
    h = pallas_matmul(x.reshape(B * S, D), layer["w_ff1"],
                      bias=layer["b_ff1"], activation="gelu")       # fused
    o = pallas_matmul(h, layer["w_ff2"], bias=layer["b_ff2"])
    return o.reshape(B, S, D)


def reformer_autoregressive_forward(params, input_ids, labels=None, *, heads):
    B, S = input_ids.shape
    D = params["tok_emb"].shape[-1]
    V = params["lm_head"].shape[-1]

    x = (params["tok_emb"][input_ids]
         + params["pos_emb"][:S][None, :, :]).astype(jnp.bfloat16)  # [B,S,D]

    # Reversible residual stack: x duplicated into (x1, x2), averaged at end.
    x1, x2 = x, x
    for layer in params["layers"]:
        x1 = x1 + attention_block(
            layer, layer_norm(x2, layer["ln1_g"], layer["ln1_b"]), heads)
        x2 = x2 + ff_block(
            layer, layer_norm(x1, layer["ln2_g"], layer["ln2_b"]))
    hidden = 0.5 * (x1.astype(jnp.float32) + x2.astype(jnp.float32))
    hidden = layer_norm(hidden, params["norm_g"], params["norm_b"])  # bf16

    lm_logits = pallas_matmul(hidden.reshape(B * S, D), params["lm_head"],
                              out_dtype=jnp.float32).reshape(B, S, V)

    loss = None
    if labels is not None:
        shift_logits = lm_logits[:, :-1, :].reshape(-1, V)
        shift_labels = labels[:, 1:].reshape(-1)
        loss = pallas_shifted_cross_entropy(shift_logits, shift_labels)
    return lm_logits, loss


# ----------------------------------------------------------------------------
if __name__ == "__main__":
    # Small config consistent with the module's __init__ signature.
    num_tokens, dim, depth, max_seq_len, heads = 64, 32, 2, 16, 4
    B, S = 2, 16

    key = jax.random.PRNGKey(0)
    kp, ki, kl = jax.random.split(key, 3)
    params = init_params(kp, num_tokens, dim, depth, max_seq_len, heads)
    input_ids = jax.random.randint(ki, (B, S), 0, num_tokens, dtype=jnp.int32)
    labels = jax.random.randint(kl, (B, S), 0, num_tokens, dtype=jnp.int32)

    fwd = jax.jit(functools.partial(reformer_autoregressive_forward, heads=heads))
    logits, loss = fwd(params, input_ids, labels)
    jax.block_until_ready((logits, loss))

    assert logits.shape == (B, S, num_tokens)
    assert loss.shape == ()
    assert bool(jnp.isfinite(loss)) and bool(jnp.all(jnp.isfinite(logits)))
    print("KERNEL_OK")
</pallas_src>

<mosaic_0001>
module attributes {stable_mosaic.version = 11 : i64} {
  func.func @_matmul_kernel(%arg0: i32, %arg1: i32, %arg2: i32, %arg3: memref<32x32xbf16, #tpu.memory_space<vmem>>, %arg4: memref<32x96xbf16, #tpu.memory_space<vmem>>, %arg5: memref<1x96xf32, #tpu.memory_space<vmem>>, %arg6: memref<32x96xbf16, #tpu.memory_space<vmem>>, %arg7: memref<32x96xf32, #tpu.memory_space<vmem>>) attributes {dimension_semantics = [#tpu.dimension_semantics<parallel>, #tpu.dimension_semantics<parallel>, #tpu.dimension_semantics<arbitrary>], iteration_bounds = array<i64: 1, 1, 1>, scalar_prefetch = 0 : i64, scratch_operands = 1 : i64, tpu.core_type = #tpu.core_type<tc>, window_params = [{transform_indices = @transform_0, window_bounds = array<i64: 32, 32>}, {transform_indices = @transform_1, window_bounds = array<i64: 32, 96>}, {transform_indices = @transform_2, window_bounds = array<i64: 1, 96>}, {transform_indices = @transform_3, window_bounds = array<i64: 32, 96>}]} {
    %c0_i32 = arith.constant 0 : i32
    %0 = arith.cmpi eq, %arg2, %c0_i32 : i32
    %1 = arith.extui %0 : i1 to i32
    %c0_i32_0 = arith.constant 0 : i32
    %2 = arith.cmpi ne, %1, %c0_i32_0 : i32
    scf.if %2 {
      %cst_10 = arith.constant 0.000000e+00 : f32
      %12 = vector.broadcast %cst_10 : f32 to vector<32x96xf32>
      %c0_11 = arith.constant 0 : index
      %c0_12 = arith.constant 0 : index
      %13 = vector.load %arg7[%c0_11, %c0_12] : memref<32x96xf32, #tpu.memory_space<vmem>>, vector<32x96xf32>
      tpu.vector_store %arg7[%c0_11, %c0_12], %12 {strides = array<i32>} : memref<32x96xf32, #tpu.memory_space<vmem>>, vector<32x96xf32>,
    } else {
    }
    %c0 = arith.constant 0 : index
    %c0_1 = arith.constant 0 : index
    %3 = vector.load %arg7[%c0, %c0_1] : memref<32x96xf32, #tpu.memory_space<vmem>>, vector<32x96xf32>
    %c0_2 = arith.constant 0 : index
    %c0_3 = arith.constant 0 : index
    %4 = vector.load %arg3[%c0_2, %c0_3] : memref<32x32xbf16, #tpu.memory_space<vmem>>, vector<32x32xbf16>
    %c0_4 = arith.constant 0 : index
    %c0_5 = arith.constant 0 : index
    %5 = vector.load %arg4[%c0_4, %c0_5] : memref<32x96xbf16, #tpu.memory_space<vmem>>, vector<32x96xbf16>
    %cst = arith.constant dense<0.000000e+00> : vector<32x96xf32>
    %6 = tpu.matmul %4, %5, %cst {dimension_numbers = #tpu.dot_dimension_numbers<[1], [0], [0], [1], [0, 0, 1, 1], [], []>} : vector<32x32xbf16>, vector<32x96xbf16>, vector<32x96xf32> -> vector<32x96xf32>
    %7 = arith.addf %3, %6 : vector<32x96xf32>
    %c0_6 = arith.constant 0 : index
    %c0_7 = arith.constant 0 : index
    %8 = vector.load %arg7[%c0_6, %c0_7] : memref<32x96xf32, #tpu.memory_space<vmem>>, vector<32x96xf32>
    tpu.vector_store %arg7[%c0_6, %c0_7], %7 {strides = array<i32>} : memref<32x96xf32, #tpu.memory_space<vmem>>, vector<32x96xf32>,
    %c0_i32_8 = arith.constant 0 : i32
    %9 = arith.cmpi eq, %arg2, %c0_i32_8 : i32
    %10 = arith.extui %9 : i1 to i32
    %c0_i32_9 = arith.constant 0 : i32
    %11 = arith.cmpi ne, %10, %c0_i32_9 : i32
    scf.if %11 {
      %c0_10 = arith.constant 0 : index
      %c0_11 = arith.constant 0 : index
      %12 = vector.load %arg7[%c0_10, %c0_11] : memref<32x96xf32, #tpu.memory_space<vmem>>, vector<32x96xf32>
      %c0_12 = arith.constant 0 : index
      %c0_13 = arith.constant 0 : index
      %13 = vector.load %arg5[%c0_12, %c0_13] : memref<1x96xf32, #tpu.memory_space<vmem>>, vector<1x96xf32>
      %14 = vector.broadcast %13 : vector<1x96xf32> to vector<32x96xf32>
      %15 = arith.addf %12, %14 : vector<32x96xf32>
      %16 = arith.truncf %15 : vector<32x96xf32> to vector<32x96xbf16>
      %c0_14 = arith.constant 0 : index
      %c0_15 = arith.constant 0 : index
      %17 = vector.load %arg6[%c0_14, %c0_15] : memref<32x96xbf16, #tpu.memory_space<vmem>>, vector<32x96xbf16>
      tpu.vector_store %arg6[%c0_14, %c0_15], %16 {strides = array<i32>} : memref<32x96xbf16, #tpu.memory_space<vmem>>, vector<32x96xbf16>,
    } else {
    }
    return
  }
  func.func @transform_0(%arg0: i32, %arg1: i32, %arg2: i32) -> (i32, i32) {
    %c0_i32 = arith.constant 0 : i32
    return %arg0, %arg2 : i32, i32
  }
  func.func @transform_1(%arg0: i32, %arg1: i32, %arg2: i32) -> (i32, i32) {
    %c0_i32 = arith.constant 0 : i32
    return %arg2, %arg1 : i32, i32
  }
  func.func @transform_2(%arg0: i32, %arg1: i32, %arg2: i32) -> (i32, i32) {
    %c0_i32 = arith.constant 0 : i32
    %c0_i32_0 = arith.constant 0 : i32
    return %c0_i32, %arg1 : i32, i32
  }
  func.func @transform_3(%arg0: i32, %arg1: i32, %arg2: i32) -> (i32, i32) {
    %c0_i32 = arith.constant 0 : i32
    return %arg0, %arg1 : i32, i32
  }
}

module attributes {stable_mosaic.version = 11 : i64} {
  func.func @_flash_attn_kernel(%arg0: i32, %arg1: i32, %arg2: i32, %arg3: memref<1x4x16x8xbf16, #tpu.memory_space<vmem>>, %arg4: memref<1x4x16x8xbf16, #tpu.memory_space<vmem>>, %arg5: memref<1x4x16x8xbf16, #tpu.memory_space<vmem>>, %arg6: memref<1x4x16x8xbf16, #tpu.memory_space<vmem>>, %arg7: memref<4x16x1xf32, #tpu.memory_space<vmem>>, %arg8: memref<4x16x1xf32, #tpu.memory_space<vmem>>, %arg9: memref<4x16x8xf32, #tpu.memory_space<vmem>>) attributes {dimension_semantics = [#tpu.dimension_semantics<parallel>, #tpu.dimension_semantics<parallel>, #tpu.dimension_semantics<arbitrary>], iteration_bounds = array<i64: 2, 1, 1>, scalar_prefetch = 0 : i64, scratch_operands = 3 : i64, tpu.core_type = #tpu.core_type<tc>, window_params = [{transform_indices = @transform_0, window_bounds = array<i64: 1, 4, 16, 8>}, {transform_indices = @transform_1, window_bounds = array<i64: 1, 4, 16, 8>}, {transform_indices = @transform_2, window_bounds = array<i64: 1, 4, 16, 8>}, {transform_indices = @transform_3, window_bounds = array<i64: 1, 4, 16, 8>}]} {
    %c0_i32 = arith.constant 0 : i32
    %0 = arith.cmpi eq, %arg2, %c0_i32 : i32
    %1 = arith.extui %0 : i1 to i32
    %c0_i32_0 = arith.constant 0 : i32
    %2 = arith.cmpi ne, %1, %c0_i32_0 : i32
    scf.if %2 {
      %cst = arith.constant 0xFF800000 : f32
      %9 = vector.broadcast %cst : f32 to vector<4x16x1xf32>
      %c0 = arith.constant 0 : index
      %c0_4 = arith.constant 0 : index
      %c0_5 = arith.constant 0 : index
      %10 = vector.load %arg7[%c0, %c0_4, %c0_5] : memref<4x16x1xf32, #tpu.memory_space<vmem>>, vector<4x16x1xf32>
      tpu.vector_store %arg7[%c0, %c0_4, %c0_5], %9 {strides = array<i32>} : memref<4x16x1xf32, #tpu.memory_space<vmem>>, vector<4x16x1xf32>,
      %cst_6 = arith.constant 0.000000e+00 : f32
      %11 = vector.broadcast %cst_6 : f32 to vector<4x16x1xf32>
      %c0_7 = arith.constant 0 : index
      %c0_8 = arith.constant 0 : index
      %c0_9 = arith.constant 0 : index
      %12 = vector.load %arg8[%c0_7, %c0_8, %c0_9] : memref<4x16x1xf32, #tpu.memory_space<vmem>>, vector<4x16x1xf32>
      tpu.vector_store %arg8[%c0_7, %c0_8, %c0_9], %11 {strides = array<i32>} : memref<4x16x1xf32, #tpu.memory_space<vmem>>, vector<4x16x1xf32>,
      %cst_10 = arith.constant 0.000000e+00 : f32
      %13 = vector.broadcast %cst_10 : f32 to vector<4x16x8xf32>
      %c0_11 = arith.constant 0 : index
      %c0_12 = arith.constant 0 : index
      %c0_13 = arith.constant 0 : index
      %14 = vector.load %arg9[%c0_11, %c0_12, %c0_13] : memref<4x16x8xf32, #tpu.memory_space<vmem>>, vector<4x16x8xf32>
      tpu.vector_store %arg9[%c0_11, %c0_12, %c0_13], %13 {strides = array<i32>} : memref<4x16x8xf32, #tpu.memory_space<vmem>>, vector<4x16x8xf32>,
    } else {
    }
    %3 = arith.cmpi sle, %arg2, %arg1 : i32
    %4 = arith.extui %3 : i1 to i32
    %c0_i32_1 = arith.constant 0 : i32
    %5 = arith.cmpi ne, %4, %c0_i32_1 : i32
    scf.if %5 {
      %c0 = arith.constant 0 : index
      %c0_4 = arith.constant 0 : index
      %c0_5 = arith.constant 0 : index
      %c0_6 = arith.constant 0 : index
      %9 = vector.load %arg3[%c0, %c0_4, %c0_5, %c0_6] : memref<1x4x16x8xbf16, #tpu.memory_space<vmem>>, vector<1x4x16x8xbf16>
      %10 = vector.shape_cast %9 : vector<1x4x16x8xbf16> to vector<4x16x8xbf16>
      %cst = arith.constant 3.535160e-01 : bf16
      %11 = vector.broadcast %cst : bf16 to vector<4x16x8xbf16>
      %12 = arith.mulf %10, %11 : vector<4x16x8xbf16>
      %c0_7 = arith.constant 0 : index
      %c0_8 = arith.constant 0 : index
      %c0_9 = arith.constant 0 : index
      %c0_10 = arith.constant 0 : index
      %13 = vector.load %arg4[%c0_7, %c0_8, %c0_9, %c0_10] : memref<1x4x16x8xbf16, #tpu.memory_space<vmem>>, vector<1x4x16x8xbf16>
      %14 = vector.shape_cast %13 : vector<1x4x16x8xbf16> to vector<4x16x8xbf16>
      "tpu.trace_start"() <{level = 10 : i32, message = "hqd,hkd->hqk"}> : () -> ()
      %cst_11 = arith.constant dense<0.000000e+00> : vector<4x16x16xf32>
      %15 = tpu.matmul %12, %14, %cst_11 {dimension_numbers = #tpu.dot_dimension_numbers<[2], [2], [1], [1], [0, 0, 0, 1, 1, 1], [0], [0]>} : vector<4x16x8xbf16>, vector<4x16x8xbf16>, vector<4x16x16xf32> -> vector<4x16x16xf32>
      "tpu.trace_stop"() : () -> ()
      %c16_i32 = arith.constant 16 : i32
      %16 = arith.muli %arg1, %c16_i32 : i32
      %17 = tpu.iota {dimensions = array<i32: 1>} : vector<4x16x16xi32>
      %18 = vector.broadcast %16 : i32 to vector<4x16x16xi32>
      %19 = arith.addi %18, %17 : vector<4x16x16xi32>
      %c16_i32_12 = arith.constant 16 : i32
      %20 = arith.muli %arg2, %c16_i32_12 : i32
      %21 = tpu.iota {dimensions = array<i32: 2>} : vector<4x16x16xi32>
      %22 = vector.broadcast %20 : i32 to vector<4x16x16xi32>
      %23 = arith.addi %22, %21 : vector<4x16x16xi32>
      %24 = arith.cmpi sle, %23, %19 : vector<4x16x16xi32>
      %cst_13 = arith.constant -1.000000e+30 : f32
      %25 = vector.broadcast %cst_13 : f32 to vector<4x16x16xf32>
      %26 = arith.select %24, %15, %25 : vector<4x16x16xi1>, vector<4x16x16xf32>
      %c0_14 = arith.constant 0 : index
      %c0_15 = arith.constant 0 : index
      %c0_16 = arith.constant 0 : index
      %27 = vector.load %arg7[%c0_14, %c0_15, %c0_16] : memref<4x16x1xf32, #tpu.memory_space<vmem>>, vector<4x16x1xf32>
      %cst_17 = arith.constant dense<0xFF800000> : vector<4x16xf32>
      %28 = vector.multi_reduction <maximumf>, %26, %cst_17 [2] : vector<4x16x16xf32> to vector<4x16xf32>
      %29 = vector.shape_cast %28 : vector<4x16xf32> to vector<4x16x1xf32>
      %30 = arith.maximumf %27, %29 : vector<4x16x1xf32>
      %31 = arith.subf %27, %30 : vector<4x16x1xf32>
      %32 = math.exp %31 : vector<4x16x1xf32>
      %33 = vector.broadcast %30 : vector<4x16x1xf32> to vector<4x16x16xf32>
      %34 = arith.subf %26, %33 : vector<4x16x16xf32>
      %35 = math.exp %34 : vector<4x16x16xf32>
      %c0_18 = arith.constant 0 : index
      %c0_19 = arith.constant 0 : index
      %c0_20 = arith.constant 0 : index
      %36 = vector.load %arg8[%c0_18, %c0_19, %c0_20] : memref<4x16x1xf32, #tpu.memory_space<vmem>>, vector<4x16x1xf32>
      %37 = arith.mulf %32, %36 : vector<4x16x1xf32>
      %cst_21 = arith.constant dense<0.000000e+00> : vector<4x16xf32>
      %38 = vector.multi_reduction <add>, %35, %cst_21 [2] : vector<4x16x16xf32> to vector<4x16xf32>
      %39 = vector.shape_cast %38 : vector<4x16xf32> to vector<4x16x1xf32>
      %40 = arith.addf %37, %39 : vector<4x16x1xf32>
      %c0_22 = arith.constant 0 : index
      %c0_23 = arith.constant 0 : index
      %c0_24 = arith.constant 0 : index
      %41 = vector.load %arg8[%c0_22, %c0_23, %c0_24] : memref<4x16x1xf32, #tpu.memory_space<vmem>>, vector<4x16x1xf32>
      tpu.vector_store %arg8[%c0_22, %c0_23, %c0_24], %40 {strides = array<i32>} : memref<4x16x1xf32, #tpu.memory_space<vmem>>, vector<4x16x1xf32>,
      %c0_25 = arith.constant 0 : index
      %c0_26 = arith.constant 0 : index
      %c0_27 = arith.constant 0 : index
      %42 = vector.load %arg9[%c0_25, %c0_26, %c0_27] : memref<4x16x8xf32, #tpu.memory_space<vmem>>, vector<4x16x8xf32>
      %43 = vector.broadcast %32 : vector<4x16x1xf32> to vector<4x16x8xf32>
      %44 = arith.mulf %43, %42 : vector<4x16x8xf32>
      %45 = arith.truncf %35 : vector<4x16x16xf32> to vector<4x16x16xbf16>
      %c0_28 = arith.constant 0 : index
      %c0_29 = arith.constant 0 : index
      %c0_30 = arith.constant 0 : index
      %c0_31 = arith.constant 0 : index
      %46 = vector.load %arg5[%c0_28, %c0_29, %c0_30, %c0_31] : memref<1x4x16x8xbf16, #tpu.memory_space<vmem>>, vector<1x4x16x8xbf16>
      %47 = vector.shape_cast %46 : vector<1x4x16x8xbf16> to vector<4x16x8xbf16>
      "tpu.trace_start"() <{level = 10 : i32, message = "hqk,hkd->hqd"}> : () -> ()
      %cst_32 = arith.constant dense<0.000000e+00> : vector<4x16x8xf32>
      %48 = tpu.matmul %45, %47, %cst_32 {dimension_numbers = #tpu.dot_dimension_numbers<[2], [1], [1], [2], [0, 0, 0, 1, 1, 2], [0], [0]>} : vector<4x16x16xbf16>, vector<4x16x8xbf16>, vector<4x16x8xf32> -> vector<4x16x8xf32>
      "tpu.trace_stop"() : () -> ()
      %49 = arith.addf %44, %48 : vector<4x16x8xf32>
      %c0_33 = arith.constant 0 : index
      %c0_34 = arith.constant 0 : index
      %c0_35 = arith.constant 0 : index
      %50 = vector.load %arg9[%c0_33, %c0_34, %c0_35] : memref<4x16x8xf32, #tpu.memory_space<vmem>>, vector<4x16x8xf32>
      tpu.vector_store %arg9[%c0_33, %c0_34, %c0_35], %49 {strides = array<i32>} : memref<4x16x8xf32, #tpu.memory_space<vmem>>, vector<4x16x8xf32>,
      %c0_36 = arith.constant 0 : index
      %c0_37 = arith.constant 0 : index
      %c0_38 = arith.constant 0 : index
      %51 = vector.load %arg7[%c0_36, %c0_37, %c0_38] : memref<4x16x1xf32, #tpu.memory_space<vmem>>, vector<4x16x1xf32>
      tpu.vector_store %arg7[%c0_36, %c0_37, %c0_38], %30 {strides = array<i32>} : memref<4x16x1xf32, #tpu.memory_space<vmem>>, vector<4x16x1xf32>,
    } else {
    }
    %c0_i32_2 = arith.constant 0 : i32
    %6 = arith.cmpi eq, %arg2, %c0_i32_2 : i32
    %7 = arith.extui %6 : i1 to i32
    %c0_i32_3 = arith.constant 0 : i32
    %8 = arith.cmpi ne, %7, %c0_i32_3 : i32
    scf.if %8 {
      %c0 = arith.constant 0 : index
      %c0_4 = arith.constant 0 : index
      %c0_5 = arith.constant 0 : index
      %9 = vector.load %arg8[%c0, %c0_4, %c0_5] : memref<4x16x1xf32, #tpu.memory_space<vmem>>, vector<4x16x1xf32>
      %10 = tpu.reciprocal %9 {approx = true} : vector<4x16x1xf32> -> vector<4x16x1xf32>
      %c0_6 = arith.constant 0 : index
      %c0_7 = arith.constant 0 : index
      %c0_8 = arith.constant 0 : index
      %11 = vector.load %arg9[%c0_6, %c0_7, %c0_8] : memref<4x16x8xf32, #tpu.memory_space<vmem>>, vector<4x16x8xf32>
      %12 = vector.broadcast %10 : vector<4x16x1xf32> to vector<4x16x8xf32>
      %13 = arith.mulf %11, %12 : vector<4x16x8xf32>
      %14 = arith.truncf %13 : vector<4x16x8xf32> to vector<4x16x8xbf16>
      %c0_9 = arith.constant 0 : index
      %c0_10 = arith.constant 0 : index
      %c0_11 = arith.constant 0 : index
      %c0_12 = arith.constant 0 : index
      %15 = vector.load %arg6[%c0_9, %c0_10, %c0_11, %c0_12] : memref<1x4x16x8xbf16, #tpu.memory_space<vmem>>, vector<1x4x16x8xbf16>
      %16 = vector.shape_cast %15 : vector<1x4x16x8xbf16> to vector<4x16x8xbf16>
      %17 = vector.shape_cast %14 : vector<4x16x8xbf16> to vector<1x4x16x8xbf16>
      tpu.vector_store %arg6[%c0_9, %c0_10, %c0_11, %c0_12], %17 {strides = array<i32>} : memref<1x4x16x8xbf16, #tpu.memory_space<vmem>>, vector<1x4x16x8xbf16>,
    } else {
    }
    return
  }
  func.func @transform_0(%arg0: i32, %arg1: i32, %arg2: i32) -> (i32, i32, i32, i32) {
    %c0_i32 = arith.constant 0 : i32
    %c0_i32_0 = arith.constant 0 : i32
    %c0_i32_1 = arith.constant 0 : i32
    return %arg0, %c0_i32, %arg1, %c0_i32_0 : i32, i32, i32, i32
  }
  func.func @transform_1(%arg0: i32, %arg1: i32, %arg2: i32) -> (i32, i32, i32, i32) {
    %0 = arith.minsi %arg2, %arg1 : i32
    %c0_i32 = arith.constant 0 : i32
    %c0_i32_0 = arith.constant 0 : i32
    %c0_i32_1 = arith.constant 0 : i32
    return %arg0, %c0_i32, %0, %c0_i32_0 : i32, i32, i32, i32
  }
  func.func @transform_2(%arg0: i32, %arg1: i32, %arg2: i32) -> (i32, i32, i32, i32) {
    %0 = arith.minsi %arg2, %arg1 : i32
    %c0_i32 = arith.constant 0 : i32
    %c0_i32_0 = arith.constant 0 : i32
    %c0_i32_1 = arith.constant 0 : i32
    return %arg0, %c0_i32, %0, %c0_i32_0 : i32, i32, i32, i32
  }
  func.func @transform_3(%arg0: i32, %arg1: i32, %arg2: i32) -> (i32, i32, i32, i32) {
    %c0_i32 = arith.constant 0 : i32
    %c0_i32_0 = arith.constant 0 : i32
    %c0_i32_1 = arith.constant 0 : i32
    return %arg0, %c0_i32, %arg1, %c0_i32_0 : i32, i32, i32, i32
  }
}

module attributes {stable_mosaic.version = 11 : i64} {
  func.func @_matmul_kernel(%arg0: i32, %arg1: i32, %arg2: i32, %arg3: memref<32x32xbf16, #tpu.memory_space<vmem>>, %arg4: memref<32x32xbf16, #tpu.memory_space<vmem>>, %arg5: memref<1x32xf32, #tpu.memory_space<vmem>>, %arg6: memref<32x32xbf16, #tpu.memory_space<vmem>>, %arg7: memref<32x32xf32, #tpu.memory_space<vmem>>) attributes {dimension_semantics = [#tpu.dimension_semantics<parallel>, #tpu.dimension_semantics<parallel>, #tpu.dimension_semantics<arbitrary>], iteration_bounds = array<i64: 1, 1, 1>, scalar_prefetch = 0 : i64, scratch_operands = 1 : i64, tpu.core_type = #tpu.core_type<tc>, window_params = [{transform_indices = @transform_0, window_bounds = array<i64: 32, 32>}, {transform_indices = @transform_1, window_bounds = array<i64: 32, 32>}, {transform_indices = @transform_2, window_bounds = array<i64: 1, 32>}, {transform_indices = @transform_3, window_bounds = array<i64: 32, 32>}]} {
    %c0_i32 = arith.constant 0 : i32
    %0 = arith.cmpi eq, %arg2, %c0_i32 : i32
    %1 = arith.extui %0 : i1 to i32
    %c0_i32_0 = arith.constant 0 : i32
    %2 = arith.cmpi ne, %1, %c0_i32_0 : i32
    scf.if %2 {
      %cst_10 = arith.constant 0.000000e+00 : f32
      %12 = vector.broadcast %cst_10 : f32 to vector<32x32xf32>
      %c0_11 = arith.constant 0 : index
      %c0_12 = arith.constant 0 : index
      %13 = vector.load %arg7[%c0_11, %c0_12] : memref<32x32xf32, #tpu.memory_space<vmem>>, vector<32x32xf32>
      tpu.vector_store %arg7[%c0_11, %c0_12], %12 {strides = array<i32>} : memref<32x32xf32, #tpu.memory_space<vmem>>, vector<32x32xf32>,
    } else {
    }
    %c0 = arith.constant 0 : index
    %c0_1 = arith.constant 0 : index
    %3 = vector.load %arg7[%c0, %c0_1] : memref<32x32xf32, #tpu.memory_space<vmem>>, vector<32x32xf32>
    %c0_2 = arith.constant 0 : index
    %c0_3 = arith.constant 0 : index
    %4 = vector.load %arg3[%c0_2, %c0_3] : memref<32x32xbf16, #tpu.memory_space<vmem>>, vector<32x32xbf16>
    %c0_4 = arith.constant 0 : index
    %c0_5 = arith.constant 0 : index
    %5 = vector.load %arg4[%c0_4, %c0_5] : memref<32x32xbf16, #tpu.memory_space<vmem>>, vector<32x32xbf16>
    %cst = arith.constant dense<0.000000e+00> : vector<32x32xf32>
    %6 = tpu.matmul %4, %5, %cst {dimension_numbers = #tpu.dot_dimension_numbers<[1], [0], [0], [1], [0, 0, 1, 1], [], []>} : vector<32x32xbf16>, vector<32x32xbf16>, vector<32x32xf32> -> vector<32x32xf32>
    %7 = arith.addf %3, %6 : vector<32x32xf32>
    %c0_6 = arith.constant 0 : index
    %c0_7 = arith.constant 0 : index
    %8 = vector.load %arg7[%c0_6, %c0_7] : memref<32x32xf32, #tpu.memory_space<vmem>>, vector<32x32xf32>
    tpu.vector_store %arg7[%c0_6, %c0_7], %7 {strides = array<i32>} : memref<32x32xf32, #tpu.memory_space<vmem>>, vector<32x32xf32>,
    %c0_i32_8 = arith.constant 0 : i32
    %9 = arith.cmpi eq, %arg2, %c0_i32_8 : i32
    %10 = arith.extui %9 : i1 to i32
    %c0_i32_9 = arith.constant 0 : i32
    %11 = arith.cmpi ne, %10, %c0_i32_9 : i32
    scf.if %11 {
      %c0_10 = arith.constant 0 : index
      %c0_11 = arith.constant 0 : index
      %12 = vector.load %arg7[%c0_10, %c0_11] : memref<32x32xf32, #tpu.memory_space<vmem>>, vector<32x32xf32>
      %c0_12 = arith.constant 0 : index
      %c0_13 = arith.constant 0 : index
      %13 = vector.load %arg5[%c0_12, %c0_13] : memref<1x32xf32, #tpu.memory_space<vmem>>, vector<1x32xf32>
      %14 = vector.broadcast %13 : vector<1x32xf32> to vector<32x32xf32>
      %15 = arith.addf %12, %14 : vector<32x32xf32>
      %16 = arith.truncf %15 : vector<32x32xf32> to vector<32x32xbf16>
      %c0_14 = arith.constant 0 : index
      %c0_15 = arith.constant 0 : index
      %17 = vector.load %arg6[%c0_14, %c0_15] : memref<32x32xbf16, #tpu.memory_space<vmem>>, vector<32x32xbf16>
      tpu.vector_store %arg6[%c0_14, %c0_15], %16 {strides = array<i32>} : memref<32x32xbf16, #tpu.memory_space<vmem>>, vector<32x32xbf16>,
    } else {
    }
    return
  }
  func.func @transform_0(%arg0: i32, %arg1: i32, %arg2: i32) -> (i32, i32) {
    %c0_i32 = arith.constant 0 : i32
    return %arg0, %arg2 : i32, i32
  }
  func.func @transform_1(%arg0: i32, %arg1: i32, %arg2: i32) -> (i32, i32) {
    %c0_i32 = arith.constant 0 : i32
    return %arg2, %arg1 : i32, i32
  }
  func.func @transform_2(%arg0: i32, %arg1: i32, %arg2: i32) -> (i32, i32) {
    %c0_i32 = arith.constant 0 : i32
    %c0_i32_0 = arith.constant 0 : i32
    return %c0_i32, %arg1 : i32, i32
  }
  func.func @transform_3(%arg0: i32, %arg1: i32, %arg2: i32) -> (i32, i32) {
    %c0_i32 = arith.constant 0 : i32
    return %arg0, %arg1 : i32, i32
  }
}

module attributes {stable_mosaic.version = 11 : i64} {
  func.func @_matmul_kernel(%arg0: i32, %arg1: i32, %arg2: i32, %arg3: memref<32x32xbf16, #tpu.memory_space<vmem>>, %arg4: memref<32x128xbf16, #tpu.memory_space<vmem>>, %arg5: memref<1x128xf32, #tpu.memory_space<vmem>>, %arg6: memref<32x128xbf16, #tpu.memory_space<vmem>>, %arg7: memref<32x128xf32, #tpu.memory_space<vmem>>) attributes {dimension_semantics = [#tpu.dimension_semantics<parallel>, #tpu.dimension_semantics<parallel>, #tpu.dimension_semantics<arbitrary>], iteration_bounds = array<i64: 1, 1, 1>, scalar_prefetch = 0 : i64, scratch_operands = 1 : i64, tpu.core_type = #tpu.core_type<tc>, window_params = [{transform_indices = @transform_0, window_bounds = array<i64: 32, 32>}, {transform_indices = @transform_1, window_bounds = array<i64: 32, 128>}, {transform_indices = @transform_2, window_bounds = array<i64: 1, 128>}, {transform_indices = @transform_3, window_bounds = array<i64: 32, 128>}]} {
    %c0_i32 = arith.constant 0 : i32
    %0 = arith.cmpi eq, %arg2, %c0_i32 : i32
    %1 = arith.extui %0 : i1 to i32
    %c0_i32_0 = arith.constant 0 : i32
    %2 = arith.cmpi ne, %1, %c0_i32_0 : i32
    scf.if %2 {
      %cst_10 = arith.constant 0.000000e+00 : f32
      %12 = vector.broadcast %cst_10 : f32 to vector<32x128xf32>
      %c0_11 = arith.constant 0 : index
      %c0_12 = arith.constant 0 : index
      %13 = vector.load %arg7[%c0_11, %c0_12] : memref<32x128xf32, #tpu.memory_space<vmem>>, vector<32x128xf32>
      tpu.vector_store %arg7[%c0_11, %c0_12], %12 {strides = array<i32>} : memref<32x128xf32, #tpu.memory_space<vmem>>, vector<32x128xf32>,
    } else {
    }
    %c0 = arith.constant 0 : index
    %c0_1 = arith.constant 0 : index
    %3 = vector.load %arg7[%c0, %c0_1] : memref<32x128xf32, #tpu.memory_space<vmem>>, vector<32x128xf32>
    %c0_2 = arith.constant 0 : index
    %c0_3 = arith.constant 0 : index
    %4 = vector.load %arg3[%c0_2, %c0_3] : memref<32x32xbf16, #tpu.memory_space<vmem>>, vector<32x32xbf16>
    %c0_4 = arith.constant 0 : index
    %c0_5 = arith.constant 0 : index
    %5 = vector.load %arg4[%c0_4, %c0_5] : memref<32x128xbf16, #tpu.memory_space<vmem>>, vector<32x128xbf16>
    %cst = arith.constant dense<0.000000e+00> : vector<32x128xf32>
    %6 = tpu.matmul %4, %5, %cst {dimension_numbers = #tpu.dot_dimension_numbers<[1], [0], [0], [1], [0, 0, 1, 1], [], []>} : vector<32x32xbf16>, vector<32x128xbf16>, vector<32x128xf32> -> vector<32x128xf32>
    %7 = arith.addf %3, %6 : vector<32x128xf32>
    %c0_6 = arith.constant 0 : index
    %c0_7 = arith.constant 0 : index
    %8 = vector.load %arg7[%c0_6, %c0_7] : memref<32x128xf32, #tpu.memory_space<vmem>>, vector<32x128xf32>
    tpu.vector_store %arg7[%c0_6, %c0_7], %7 {strides = array<i32>} : memref<32x128xf32, #tpu.memory_space<vmem>>, vector<32x128xf32>,
    %c0_i32_8 = arith.constant 0 : i32
    %9 = arith.cmpi eq, %arg2, %c0_i32_8 : i32
    %10 = arith.extui %9 : i1 to i32
    %c0_i32_9 = arith.constant 0 : i32
    %11 = arith.cmpi ne, %10, %c0_i32_9 : i32
    scf.if %11 {
      %c0_10 = arith.constant 0 : index
      %c0_11 = arith.constant 0 : index
      %12 = vector.load %arg7[%c0_10, %c0_11] : memref<32x128xf32, #tpu.memory_space<vmem>>, vector<32x128xf32>
      %c0_12 = arith.constant 0 : index
      %c0_13 = arith.constant 0 : index
      %13 = vector.load %arg5[%c0_12, %c0_13] : memref<1x128xf32, #tpu.memory_space<vmem>>, vector<1x128xf32>
      %14 = vector.broadcast %13 : vector<1x128xf32> to vector<32x128xf32>
      %15 = arith.addf %12, %14 : vector<32x128xf32>
      %16 = arith.mulf %15, %15 : vector<32x128xf32>
      %17 = arith.mulf %15, %16 : vector<32x128xf32>
      %cst_14 = arith.constant 4.471500e-02 : f32
      %18 = vector.broadcast %cst_14 : f32 to vector<32x128xf32>
      %19 = arith.mulf %18, %17 : vector<32x128xf32>
      %20 = arith.addf %15, %19 : vector<32x128xf32>
      %cst_15 = arith.constant 0.797884583 : f32
      %21 = vector.broadcast %cst_15 : f32 to vector<32x128xf32>
      %22 = arith.mulf %21, %20 : vector<32x128xf32>
      %23 = math.tanh %22 : vector<32x128xf32>
      %cst_16 = arith.constant 1.000000e+00 : f32
      %24 = vector.broadcast %cst_16 : f32 to vector<32x128xf32>
      %25 = arith.addf %24, %23 : vector<32x128xf32>
      %cst_17 = arith.constant 5.000000e-01 : f32
      %26 = vector.broadcast %cst_17 : f32 to vector<32x128xf32>
      %27 = arith.mulf %26, %25 : vector<32x128xf32>
      %28 = arith.mulf %15, %27 : vector<32x128xf32>
      %29 = arith.truncf %28 : vector<32x128xf32> to vector<32x128xbf16>
      %c0_18 = arith.constant 0 : index
      %c0_19 = arith.constant 0 : index
      %30 = vector.load %arg6[%c0_18, %c0_19] : memref<32x128xbf16, #tpu.memory_space<vmem>>, vector<32x128xbf16>
      tpu.vector_store %arg6[%c0_18, %c0_19], %29 {strides = array<i32>} : memref<32x128xbf16, #tpu.memory_space<vmem>>, vector<32x128xbf16>,
    } else {
    }
    return
  }
  func.func @transform_0(%arg0: i32, %arg1: i32, %arg2: i32) -> (i32, i32) {
    %c0_i32 = arith.constant 0 : i32
    return %arg0, %arg2 : i32, i32
  }
  func.func @transform_1(%arg0: i32, %arg1: i32, %arg2: i32) -> (i32, i32) {
    %c0_i32 = arith.constant 0 : i32
    return %arg2, %arg1 : i32, i32
  }
  func.func @transform_2(%arg0: i32, %arg1: i32, %arg2: i32) -> (i32, i32) {
    %c0_i32 = arith.constant 0 : i32
    %c0_i32_0 = arith.constant 0 : i32
    return %c0_i32, %arg1 : i32, i32
  }
  func.func @transform_3(%arg0: i32, %arg1: i32, %arg2: i32) -> (i32, i32) {
    %c0_i32 = arith.constant 0 : i32
    return %arg0, %arg1 : i32, i32
  }
}

module attributes {stable_mosaic.version = 11 : i64} {
  func.func @_matmul_kernel(%arg0: i32, %arg1: i32, %arg2: i32, %arg3: memref<32x128xbf16, #tpu.memory_space<vmem>>, %arg4: memref<128x32xbf16, #tpu.memory_space<vmem>>, %arg5: memref<1x32xf32, #tpu.memory_space<vmem>>, %arg6: memref<32x32xbf16, #tpu.memory_space<vmem>>, %arg7: memref<32x32xf32, #tpu.memory_space<vmem>>) attributes {dimension_semantics = [#tpu.dimension_semantics<parallel>, #tpu.dimension_semantics<parallel>, #tpu.dimension_semantics<arbitrary>], iteration_bounds = array<i64: 1, 1, 1>, scalar_prefetch = 0 : i64, scratch_operands = 1 : i64, tpu.core_type = #tpu.core_type<tc>, window_params = [{transform_indices = @transform_0, window_bounds = array<i64: 32, 128>}, {transform_indices = @transform_1, window_bounds = array<i64: 128, 32>}, {transform_indices = @transform_2, window_bounds = array<i64: 1, 32>}, {transform_indices = @transform_3, window_bounds = array<i64: 32, 32>}]} {
    %c0_i32 = arith.constant 0 : i32
    %0 = arith.cmpi eq, %arg2, %c0_i32 : i32
    %1 = arith.extui %0 : i1 to i32
    %c0_i32_0 = arith.constant 0 : i32
    %2 = arith.cmpi ne, %1, %c0_i32_0 : i32
    scf.if %2 {
      %cst_10 = arith.constant 0.000000e+00 : f32
      %12 = vector.broadcast %cst_10 : f32 to vector<32x32xf32>
      %c0_11 = arith.constant 0 : index
      %c0_12 = arith.constant 0 : index
      %13 = vector.load %arg7[%c0_11, %c0_12] : memref<32x32xf32, #tpu.memory_space<vmem>>, vector<32x32xf32>
      tpu.vector_store %arg7[%c0_11, %c0_12], %12 {strides = array<i32>} : memref<32x32xf32, #tpu.memory_space<vmem>>, vector<32x32xf32>,
    } else {
    }
    %c0 = arith.constant 0 : index
    %c0_1 = arith.constant 0 : index
    %3 = vector.load %arg7[%c0, %c0_1] : memref<32x32xf32, #tpu.memory_space<vmem>>, vector<32x32xf32>
    %c0_2 = arith.constant 0 : index
    %c0_3 = arith.constant 0 : index
    %4 = vector.load %arg3[%c0_2, %c0_3] : memref<32x128xbf16, #tpu.memory_space<vmem>>, vector<32x128xbf16>
    %c0_4 = arith.constant 0 : index
    %c0_5 = arith.constant 0 : index
    %5 = vector.load %arg4[%c0_4, %c0_5] : memref<128x32xbf16, #tpu.memory_space<vmem>>, vector<128x32xbf16>
    %cst = arith.constant dense<0.000000e+00> : vector<32x32xf32>
    %6 = tpu.matmul %4, %5, %cst {dimension_numbers = #tpu.dot_dimension_numbers<[1], [0], [0], [1], [0, 0, 1, 1], [], []>} : vector<32x128xbf16>, vector<128x32xbf16>, vector<32x32xf32> -> vector<32x32xf32>
    %7 = arith.addf %3, %6 : vector<32x32xf32>
    %c0_6 = arith.constant 0 : index
    %c0_7 = arith.constant 0 : index
    %8 = vector.load %arg7[%c0_6, %c0_7] : memref<32x32xf32, #tpu.memory_space<vmem>>, vector<32x32xf32>
    tpu.vector_store %arg7[%c0_6, %c0_7], %7 {strides = array<i32>} : memref<32x32xf32, #tpu.memory_space<vmem>>, vector<32x32xf32>,
    %c0_i32_8 = arith.constant 0 : i32
    %9 = arith.cmpi eq, %arg2, %c0_i32_8 : i32
    %10 = arith.extui %9 : i1 to i32
    %c0_i32_9 = arith.constant 0 : i32
    %11 = arith.cmpi ne, %10, %c0_i32_9 : i32
    scf.if %11 {
      %c0_10 = arith.constant 0 : index
      %c0_11 = arith.constant 0 : index
      %12 = vector.load %arg7[%c0_10, %c0_11] : memref<32x32xf32, #tpu.memory_space<vmem>>, vector<32x32xf32>
      %c0_12 = arith.constant 0 : index
      %c0_13 = arith.constant 0 : index
      %13 = vector.load %arg5[%c0_12, %c0_13] : memref<1x32xf32, #tpu.memory_space<vmem>>, vector<1x32xf32>
      %14 = vector.broadcast %13 : vector<1x32xf32> to vector<32x32xf32>
      %15 = arith.addf %12, %14 : vector<32x32xf32>
      %16 = arith.truncf %15 : vector<32x32xf32> to vector<32x32xbf16>
      %c0_14 = arith.constant 0 : index
      %c0_15 = arith.constant 0 : index
      %17 = vector.load %arg6[%c0_14, %c0_15] : memref<32x32xbf16, #tpu.memory_space<vmem>>, vector<32x32xbf16>
      tpu.vector_store %arg6[%c0_14, %c0_15], %16 {strides = array<i32>} : memref<32x32xbf16, #tpu.memory_space<vmem>>, vector<32x32xbf16>,
    } else {
    }
    return
  }
  func.func @transform_0(%arg0: i32, %arg1: i32, %arg2: i32) -> (i32, i32) {
    %c0_i32 = arith.constant 0 : i32
    return %arg0, %arg2 : i32, i32
  }
  func.func @transform_1(%arg0: i32, %arg1: i32, %arg2: i32) -> (i32, i32) {
    %c0_i32 = arith.constant 0 : i32
    return %arg2, %arg1 : i32, i32
  }
  func.func @transform_2(%arg0: i32, %arg1: i32, %arg2: i32) -> (i32, i32) {
    %c0_i32 = arith.constant 0 : i32
    %c0_i32_0 = arith.constant 0 : i32
    return %c0_i32, %arg1 : i32, i32
  }
  func.func @transform_3(%arg0: i32, %arg1: i32, %arg2: i32) -> (i32, i32) {
    %c0_i32 = arith.constant 0 : i32
    return %arg0, %arg1 : i32, i32
  }
}

module attributes {stable_mosaic.version = 11 : i64} {
  func.func @_matmul_kernel(%arg0: i32, %arg1: i32, %arg2: i32, %arg3: memref<32x32xbf16, #tpu.memory_space<vmem>>, %arg4: memref<32x64xbf16, #tpu.memory_space<vmem>>, %arg5: memref<1x64xf32, #tpu.memory_space<vmem>>, %arg6: memref<32x64xf32, #tpu.memory_space<vmem>>, %arg7: memref<32x64xf32, #tpu.memory_space<vmem>>) attributes {dimension_semantics = [#tpu.dimension_semantics<parallel>, #tpu.dimension_semantics<parallel>, #tpu.dimension_semantics<arbitrary>], iteration_bounds = array<i64: 1, 1, 1>, scalar_prefetch = 0 : i64, scratch_operands = 1 : i64, tpu.core_type = #tpu.core_type<tc>, window_params = [{transform_indices = @transform_0, window_bounds = array<i64: 32, 32>}, {transform_indices = @transform_1, window_bounds = array<i64: 32, 64>}, {transform_indices = @transform_2, window_bounds = array<i64: 1, 64>}, {transform_indices = @transform_3, window_bounds = array<i64: 32, 64>}]} {
    %c0_i32 = arith.constant 0 : i32
    %0 = arith.cmpi eq, %arg2, %c0_i32 : i32
    %1 = arith.extui %0 : i1 to i32
    %c0_i32_0 = arith.constant 0 : i32
    %2 = arith.cmpi ne, %1, %c0_i32_0 : i32
    scf.if %2 {
      %cst_10 = arith.constant 0.000000e+00 : f32
      %12 = vector.broadcast %cst_10 : f32 to vector<32x64xf32>
      %c0_11 = arith.constant 0 : index
      %c0_12 = arith.constant 0 : index
      %13 = vector.load %arg7[%c0_11, %c0_12] : memref<32x64xf32, #tpu.memory_space<vmem>>, vector<32x64xf32>
      tpu.vector_store %arg7[%c0_11, %c0_12], %12 {strides = array<i32>} : memref<32x64xf32, #tpu.memory_space<vmem>>, vector<32x64xf32>,
    } else {
    }
    %c0 = arith.constant 0 : index
    %c0_1 = arith.constant 0 : index
    %3 = vector.load %arg7[%c0, %c0_1] : memref<32x64xf32, #tpu.memory_space<vmem>>, vector<32x64xf32>
    %c0_2 = arith.constant 0 : index
    %c0_3 = arith.constant 0 : index
    %4 = vector.load %arg3[%c0_2, %c0_3] : memref<32x32xbf16, #tpu.memory_space<vmem>>, vector<32x32xbf16>
    %c0_4 = arith.constant 0 : index
    %c0_5 = arith.constant 0 : index
    %5 = vector.load %arg4[%c0_4, %c0_5] : memref<32x64xbf16, #tpu.memory_space<vmem>>, vector<32x64xbf16>
    %cst = arith.constant dense<0.000000e+00> : vector<32x64xf32>
    %6 = tpu.matmul %4, %5, %cst {dimension_numbers = #tpu.dot_dimension_numbers<[1], [0], [0], [1], [0, 0, 1, 1], [], []>} : vector<32x32xbf16>, vector<32x64xbf16>, vector<32x64xf32> -> vector<32x64xf32>
    %7 = arith.addf %3, %6 : vector<32x64xf32>
    %c0_6 = arith.constant 0 : index
    %c0_7 = arith.constant 0 : index
    %8 = vector.load %arg7[%c0_6, %c0_7] : memref<32x64xf32, #tpu.memory_space<vmem>>, vector<32x64xf32>
    tpu.vector_store %arg7[%c0_6, %c0_7], %7 {strides = array<i32>} : memref<32x64xf32, #tpu.memory_space<vmem>>, vector<32x64xf32>,
    %c0_i32_8 = arith.constant 0 : i32
    %9 = arith.cmpi eq, %arg2, %c0_i32_8 : i32
    %10 = arith.extui %9 : i1 to i32
    %c0_i32_9 = arith.constant 0 : i32
    %11 = arith.cmpi ne, %10, %c0_i32_9 : i32
    scf.if %11 {
      %c0_10 = arith.constant 0 : index
      %c0_11 = arith.constant 0 : index
      %12 = vector.load %arg7[%c0_10, %c0_11] : memref<32x64xf32, #tpu.memory_space<vmem>>, vector<32x64xf32>
      %c0_12 = arith.constant 0 : index
      %c0_13 = arith.constant 0 : index
      %13 = vector.load %arg5[%c0_12, %c0_13] : memref<1x64xf32, #tpu.memory_space<vmem>>, vector<1x64xf32>
      %14 = vector.broadcast %13 : vector<1x64xf32> to vector<32x64xf32>
      %15 = arith.addf %12, %14 : vector<32x64xf32>
      %c0_14 = arith.constant 0 : index
      %c0_15 = arith.constant 0 : index
      %16 = vector.load %arg6[%c0_14, %c0_15] : memref<32x64xf32, #tpu.memory_space<vmem>>, vector<32x64xf32>
      tpu.vector_store %arg6[%c0_14, %c0_15], %15 {strides = array<i32>} : memref<32x64xf32, #tpu.memory_space<vmem>>, vector<32x64xf32>,
    } else {
    }
    return
  }
  func.func @transform_0(%arg0: i32, %arg1: i32, %arg2: i32) -> (i32, i32) {
    %c0_i32 = arith.constant 0 : i32
    return %arg0, %arg2 : i32, i32
  }
  func.func @transform_1(%arg0: i32, %arg1: i32, %arg2: i32) -> (i32, i32) {
    %c0_i32 = arith.constant 0 : i32
    return %arg2, %arg1 : i32, i32
  }
  func.func @transform_2(%arg0: i32, %arg1: i32, %arg2: i32) -> (i32, i32) {
    %c0_i32 = arith.constant 0 : i32
    %c0_i32_0 = arith.constant 0 : i32
    return %c0_i32, %arg1 : i32, i32
  }
  func.func @transform_3(%arg0: i32, %arg1: i32, %arg2: i32) -> (i32, i32) {
    %c0_i32 = arith.constant 0 : i32
    return %arg0, %arg1 : i32, i32
  }
}

module attributes {stable_mosaic.version = 11 : i64} {
  func.func @_ce_kernel(%arg0: i32, %arg1: memref<32x64xf32, #tpu.memory_space<vmem>>, %arg2: memref<32x1xi32, #tpu.memory_space<vmem>>, %arg3: memref<1x1xf32, #tpu.memory_space<vmem>>, %arg4: memref<1x1xf32, #tpu.memory_space<vmem>>) attributes {dimension_semantics = [#tpu.dimension_semantics<arbitrary>], iteration_bounds = array<i64: 1>, scalar_prefetch = 0 : i64, scratch_operands = 0 : i64, tpu.core_type = #tpu.core_type<tc>, window_params = [{transform_indices = @transform_0, window_bounds = array<i64: 32, 64>}, {transform_indices = @transform_1, window_bounds = array<i64: 32, 1>}, {pipeline_mode = #tpu.pipeline_mode<synchronous>, transform_indices = @transform_2, window_bounds = array<i64: 1, 1>}, {pipeline_mode = #tpu.pipeline_mode<synchronous>, transform_indices = @transform_3, window_bounds = array<i64: 1, 1>}]} {
    %c0_i32 = arith.constant 0 : i32
    %0 = arith.cmpi eq, %arg0, %c0_i32 : i32
    %1 = arith.extui %0 : i1 to i32
    %c0_i32_0 = arith.constant 0 : i32
    %2 = arith.cmpi ne, %1, %c0_i32_0 : i32
    scf.if %2 {
      %cst_18 = arith.constant 0.000000e+00 : f32
      %43 = vector.broadcast %cst_18 : f32 to vector<1x1xf32>
      %c0_19 = arith.constant 0 : index
      %c0_20 = arith.constant 0 : index
      %44 = vector.load %arg3[%c0_19, %c0_20] : memref<1x1xf32, #tpu.memory_space<vmem>>, vector<1x1xf32>
      tpu.vector_store %arg3[%c0_19, %c0_20], %43 {strides = array<i32>} : memref<1x1xf32, #tpu.memory_space<vmem>>, vector<1x1xf32>,
      %cst_21 = arith.constant 0.000000e+00 : f32
      %45 = vector.broadcast %cst_21 : f32 to vector<1x1xf32>
      %c0_22 = arith.constant 0 : index
      %c0_23 = arith.constant 0 : index
      %46 = vector.load %arg4[%c0_22, %c0_23] : memref<1x1xf32, #tpu.memory_space<vmem>>, vector<1x1xf32>
      tpu.vector_store %arg4[%c0_22, %c0_23], %45 {strides = array<i32>} : memref<1x1xf32, #tpu.memory_space<vmem>>, vector<1x1xf32>,
    } else {
    }
    %c0 = arith.constant 0 : index
    %c0_1 = arith.constant 0 : index
    %3 = vector.load %arg1[%c0, %c0_1] : memref<32x64xf32, #tpu.memory_space<vmem>>, vector<32x64xf32>
    %c0_2 = arith.constant 0 : index
    %c0_3 = arith.constant 0 : index
    %4 = vector.load %arg2[%c0_2, %c0_3] : memref<32x1xi32, #tpu.memory_space<vmem>>, vector<32x1xi32>
    %cst = arith.constant dense<0xFF800000> : vector<32xf32>
    %5 = vector.multi_reduction <maximumf>, %3, %cst [1] : vector<32x64xf32> to vector<32xf32>
    %6 = vector.shape_cast %5 : vector<32xf32> to vector<32x1xf32>
    %7 = vector.broadcast %6 : vector<32x1xf32> to vector<32x64xf32>
    %8 = arith.subf %3, %7 : vector<32x64xf32>
    %9 = math.exp %8 : vector<32x64xf32>
    %cst_4 = arith.constant dense<0.000000e+00> : vector<32xf32>
    %10 = vector.multi_reduction <add>, %9, %cst_4 [1] : vector<32x64xf32> to vector<32xf32>
    %11 = vector.shape_cast %10 : vector<32xf32> to vector<32x1xf32>
    %12 = math.log %11 : vector<32x1xf32>
    %13 = arith.addf %12, %6 : vector<32x1xf32>
    %14 = tpu.iota {dimensions = array<i32: 1>} : vector<32x64xi32>
    %15 = vector.broadcast %4 : vector<32x1xi32> to vector<32x64xi32>
    %16 = arith.cmpi eq, %14, %15 : vector<32x64xi32>
    %cst_5 = arith.constant 0.000000e+00 : f32
    %17 = vector.broadcast %cst_5 : f32 to vector<32x64xf32>
    %18 = arith.select %16, %3, %17 : vector<32x64xi1>, vector<32x64xf32>
    %cst_6 = arith.constant dense<0.000000e+00> : vector<32xf32>
    %19 = vector.multi_reduction <add>, %18, %cst_6 [1] : vector<32x64xf32> to vector<32xf32>
    %20 = vector.shape_cast %19 : vector<32xf32> to vector<32x1xf32>
    %c0_i32_7 = arith.constant 0 : i32
    %21 = vector.broadcast %c0_i32_7 : i32 to vector<32x1xi32>
    %22 = arith.cmpi ne, %4, %21 : vector<32x1xi32>
    %23 = arith.extui %22 : vector<32x1xi1> to vector<32x1xi32>
    %24 = arith.sitofp %23 : vector<32x1xi32> to vector<32x1xf32>
    %c0_8 = arith.constant 0 : index
    %c0_9 = arith.constant 0 : index
    %25 = vector.load %arg3[%c0_8, %c0_9] : memref<1x1xf32, #tpu.memory_space<vmem>>, vector<1x1xf32>
    %26 = arith.subf %13, %20 : vector<32x1xf32>
    %27 = arith.mulf %26, %24 : vector<32x1xf32>
    %28 = vector.shape_cast %27 : vector<32x1xf32> to vector<1x32x1xf32>
    %cst_10 = arith.constant dense<0.000000e+00> : vector<1xf32>
    %29 = vector.multi_reduction <add>, %28, %cst_10 [1, 2] : vector<1x32x1xf32> to vector<1xf32>
    %30 = vector.shape_cast %29 : vector<1xf32> to vector<1x1x1xf32>
    %31 = vector.extract %30[0, 0, 0] : f32 from vector<1x1x1xf32>
    %32 = vector.broadcast %31 : f32 to vector<1x1xf32>
    %33 = arith.addf %25, %32 : vector<1x1xf32>
    %c0_11 = arith.constant 0 : index
    %c0_12 = arith.constant 0 : index
    %34 = vector.load %arg3[%c0_11, %c0_12] : memref<1x1xf32, #tpu.memory_space<vmem>>, vector<1x1xf32>
    tpu.vector_store %arg3[%c0_11, %c0_12], %33 {strides = array<i32>} : memref<1x1xf32, #tpu.memory_space<vmem>>, vector<1x1xf32>,
    %c0_13 = arith.constant 0 : index
    %c0_14 = arith.constant 0 : index
    %35 = vector.load %arg4[%c0_13, %c0_14] : memref<1x1xf32, #tpu.memory_space<vmem>>, vector<1x1xf32>
    %36 = vector.shape_cast %24 : vector<32x1xf32> to vector<1x32x1xf32>
    %cst_15 = arith.constant dense<0.000000e+00> : vector<1xf32>
    %37 = vector.multi_reduction <add>, %36, %cst_15 [1, 2] : vector<1x32x1xf32> to vector<1xf32>
    %38 = vector.shape_cast %37 : vector<1xf32> to vector<1x1x1xf32>
    %39 = vector.extract %38[0, 0, 0] : f32 from vector<1x1x1xf32>
    %40 = vector.broadcast %39 : f32 to vector<1x1xf32>
    %41 = arith.addf %35, %40 : vector<1x1xf32>
    %c0_16 = arith.constant 0 : index
    %c0_17 = arith.constant 0 : index
    %42 = vector.load %arg4[%c0_16, %c0_17] : memref<1x1xf32, #tpu.memory_space<vmem>>, vector<1x1xf32>
    tpu.vector_store %arg4[%c0_16, %c0_17], %41 {strides = array<i32>} : memref<1x1xf32, #tpu.memory_space<vmem>>, vector<1x1xf32>,
    return
  }
  func.func @transform_0(%arg0: i32) -> (i32, i32) {
    %c0_i32 = arith.constant 0 : i32
    %c0_i32_0 = arith.constant 0 : i32
    return %arg0, %c0_i32 : i32, i32
  }
  func.func @transform_1(%arg0: i32) -> (i32, i32) {
    %c0_i32 = arith.constant 0 : i32
    %c0_i32_0 = arith.constant 0 : i32
    return %arg0, %c0_i32 : i32, i32
  }
  func.func @transform_2(%arg0: i32) -> (i32, i32) {
    %c0_i32 = arith.constant 0 : i32
    %c0_i32_0 = arith.constant 0 : i32
    %c0_i32_1 = arith.constant 0 : i32
    return %c0_i32, %c0_i32_0 : i32, i32
  }
  func.func @transform_3(%arg0: i32) -> (i32, i32) {
    %c0_i32 = arith.constant 0 : i32
    %c0_i32_0 = arith.constant 0 : i32
    %c0_i32_1 = arith.constant 0 : i32
    return %c0_i32, %c0_i32_0 : i32, i32
  }
}

</mosaic_0001>

<bundles_post_ra>
// kernel: reformer_autoregressive_forward.12
= control target key start
LH: loop header
LB: loop body
LE: loop exit
PB: predicated region body
PF: predicated region fallthrough
CT: control target
= control target key end

     0   :  { %vm19_vm0 = vcmask 785408   ;;  %v198_v1 = vmov 0.0   ;;  %vm58_vm1 = vcmask 261120   ;;  %vm157_vm2 = vcmask 781312   ;;  %s254_s1 = inlined_call_operand.vmem [shape: bf16[32,96], index: 1, kind: input, shape index: {}]   ;;  %s255_s0 = inlined_call_operand.vmem [shape: bf16[32,32], index: 0, kind: input, shape index: {}]   ;;  %s256_s2 = inlined_call_operand.vmem [shape: f32[1,96], index: 2, kind: input, shape index: {}]   ;;  %s257_s3 = inlined_call_operand.vmem [shape: bf16[32,96], index: 3, kind: output, shape index: {}]  }
   0x1   :  { %v194_v0 = vld [vmem:[%s254_s1] sm:$0xff]   ;;  %22 = vst.msk [vmem:[#allocation2 + $0x10] sm:$0xff] %vm19_vm0, %v198_v1  ;;  %20 = vst.msk [vmem:[#allocation2] sm:$0xff] %vm19_vm0, %v198_v1  ;;  %v195_v2 = vld [vmem:[%s254_s1 + $0x8] sm:$0xff]  }
   0x2   :  { %21 = vst.msk [vmem:[#allocation2 + $0x8] sm:$0xff] %vm19_vm0, %v198_v1  ;;  %23 = vst.msk [vmem:[#allocation2 + $0x18] sm:$0xff] %vm19_vm0, %v198_v1  ;;  %185 = vmatprep.subr.bf16.mxu0 %v194_v0  ;;  %v196_v3 = vld [vmem:[%s255_s0] sm:$0xff]   ;;  %v197_v4 = vld [vmem:[%s255_s0 + $0x8] sm:$0xff]  }
   0x3   :  { %186 = vmatpush3.bf16.msra.mxu0 %v194_v0  ;;  %189 = vmatprep.mubr.msk.bf16.mxu0 %vm58_vm1, %v196_v3  ;;  %v172_v17 = vld [vmem:[%s256_s2] ss:$0 sm:$0xff] }
   0x4   :  { %187 = vmatprep.subr.bf16.mxu0 %v195_v2 }
   0x7   :  { %188 = vmatpush3.bf16.msra.mxu0 %v195_v2 }
   0x8   :  { %v26_v5 = vld [vmem:[#allocation2 + $0x10] sm:$0xff]  ;;  %v24_v6 = vld [vmem:[#allocation2] sm:$0xff] }
   0x9   :  { %v27_v8 = vld [vmem:[#allocation2 + $0x18] sm:$0xff]  ;;  %v25_v11 = vld [vmem:[#allocation2 + $0x8] sm:$0xff] }
   0xa   :  { %190 = vmatmul.mubr.msk.bf16.vlgmr.msra.gmra.mrb[0].mxu0 %vm58_vm1, %v197_v4 }
  0xdd   :  { %v191_v7 = vpop.f32.mrb[0].mxu0 }
  0xde   :  { %v116_v9 = vadd.f32 %v191_v7, %v26_v5  ;;  %v99_v10 = vpop.f32.mrb[1].mxu0 }
  0xdf   :  { %v114_v12 = vadd.f32 %v99_v10, %v24_v6  ;;  %v192_v13 = vpop.f32.mrb[2].mxu0 }
  0xe0   :  { %121 = vst.msk [vmem:[#allocation2 + $0x10] sm:$0xff] %vm19_vm0, %v116_v9  ;;  %v117_v14 = vadd.f32 %v192_v13, %v27_v8  ;;  %v102_v15 = vpop.f32.mrb[3].mxu0 }
  0xe1   :  { %119 = vst.msk [vmem:[#allocation2] sm:$0xff] %vm19_vm0, %v114_v12  ;;  %v115_v16 = vadd.f32 %v102_v15, %v25_v11 }
  0xe2   :  { %122 = vst.msk [vmem:[#allocation2 + $0x18] sm:$0xff] %vm19_vm0, %v117_v14 }
  0xe3   :  { %120 = vst.msk [vmem:[#allocation2 + $0x8] sm:$0xff] %vm19_vm0, %v115_v16 }
  0xe7   :  { %v128_v18 = vld [vmem:[#allocation2 + $0x10] sm:$0xff] }
  0xe8   :  { %v139_v19 = vadd.f32 %v172_v17, %v128_v18  ;;  %v126_v20 = vld [vmem:[#allocation2] sm:$0xff] }
  0xe9   :  { %v137_v21 = vadd.f32 %v172_v17, %v126_v20  ;;  %v129_v22 = vld [vmem:[#allocation2 + $0x18] sm:$0xff] }
  0xea   :  { %v179_v23 = vpack.c.bf16 %v139_v19, %v139_v19  ;;  %v140_v24 = vadd.f32 %v172_v17, %v129_v22  ;;  %v127_v25 = vld [vmem:[#allocation2 + $0x8] sm:$0xff] }
  0xeb   :  { %v177_v26 = vpack.c.bf16 %v137_v21, %v137_v21  ;;  %v138_v27 = vadd.f32 %v172_v17, %v127_v25 }
  0xec   :  { %160 = vst.msk [vmem:[%s257_s3 + $0x8] sm:$0xf] %vm157_vm2, %v179_v23  ;;  %v180_v28 = vpack.c.bf16 %v140_v24, %v140_v24 }
  0xed   :  { %158 = vst.msk [vmem:[%s257_s3] sm:$0xf] %vm157_vm2, %v177_v26  ;;  %v178_v29 = vpack.c.bf16 %v138_v27, %v138_v27 }
  0xee   :  { %161 = vst.msk [vmem:[%s257_s3 + $0xc] sm:$0xf] %vm157_vm2, %v180_v28 }
  0xef   :  { %159 = vst.msk [vmem:[%s257_s3 + $0x4] sm:$0xf] %vm157_vm2, %v178_v29 }

// kernel: reformer_autoregressive_forward.14
= control target key start
LH: loop header
LB: loop body
LE: loop exit
PB: predicated region body
PF: predicated region fallthrough
CT: control target
= control target key end

     0   :  { %vm19_vm0 = vcmask 261120   ;;  %v197_v1 = vmov 0.0   ;;  %vm156_vm1 = vcmask 257024   ;;  %s255_s1 = inlined_call_operand.vmem [shape: bf16[32,32], index: 1, kind: input, shape index: {}]   ;;  %s256_s0 = inlined_call_operand.vmem [shape: bf16[32,32], index: 0, kind: input, shape index: {}]   ;;  %s257_s2 = inlined_call_operand.vmem [shape: f32[1,32], index: 2, kind: input, shape index: {}]   ;;  %s258_s3 = inlined_call_operand.vmem [shape: bf16[32,32], index: 3, kind: output, shape index: {}]  }
   0x1   :  { %v193_v0 = vld [vmem:[%s255_s1] sm:$0xff]   ;;  %22 = vst.msk [vmem:[#allocation2 + $0x10] sm:$0xff] %vm19_vm0, %v197_v1  ;;  %20 = vst.msk [vmem:[#allocation2] sm:$0xff] %vm19_vm0, %v197_v1  ;;  %v194_v2 = vld [vmem:[%s255_s1 + $0x8] sm:$0xff]  }
   0x2   :  { %21 = vst.msk [vmem:[#allocation2 + $0x8] sm:$0xff] %vm19_vm0, %v197_v1  ;;  %23 = vst.msk [vmem:[#allocation2 + $0x18] sm:$0xff] %vm19_vm0, %v197_v1  ;;  %184 = vmatprep.subr.bf16.mxu0 %v193_v0  ;;  %v195_v3 = vld [vmem:[%s256_s0] sm:$0xff]   ;;  %v196_v4 = vld [vmem:[%s256_s0 + $0x8] sm:$0xff]  }
   0x3   :  { %185 = vmatpush3.bf16.msra.mxu0 %v193_v0  ;;  %188 = vmatprep.mubr.msk.bf16.mxu0 %vm19_vm0, %v195_v3  ;;  %v171_v17 = vld [vmem:[%s257_s2] ss:$0 sm:$0xff] }
   0x4   :  { %186 = vmatprep.subr.bf16.mxu0 %v194_v2 }
   0x7   :  { %187 = vmatpush3.bf16.msra.mxu0 %v194_v2 }
   0x8   :  { %v26_v5 = vld [vmem:[#allocation2 + $0x10] sm:$0xff]  ;;  %v24_v6 = vld [vmem:[#allocation2] sm:$0xff] }
   0x9   :  { %v27_v8 = vld [vmem:[#allocation2 + $0x18] sm:$0xff]  ;;  %v25_v11 = vld [vmem:[#allocation2 + $0x8] sm:$0xff] }
   0xa   :  { %189 = vmatmul.mubr.msk.bf16.vlgmr.msra.gmra.mrb[0].mxu0 %vm19_vm0, %v196_v4 }
  0xdd   :  { %v190_v7 = vpop.f32.mrb[0].mxu0 }
  0xde   :  { %v116_v9 = vadd.f32 %v190_v7, %v26_v5  ;;  %v99_v10 = vpop.f32.mrb[1].mxu0 }
  0xdf   :  { %v114_v12 = vadd.f32 %v99_v10, %v24_v6  ;;  %v191_v13 = vpop.f32.mrb[2].mxu0 }
  0xe0   :  { %120 = vst.msk [vmem:[#allocation2 + $0x10] sm:$0xff] %vm19_vm0, %v116_v9  ;;  %v117_v14 = vadd.f32 %v191_v13, %v27_v8  ;;  %v102_v15 = vpop.f32.mrb[3].mxu0 }
  0xe1   :  { %118 = vst.msk [vmem:[#allocation2] sm:$0xff] %vm19_vm0, %v114_v12  ;;  %v115_v16 = vadd.f32 %v102_v15, %v25_v11 }
  0xe2   :  { %121 = vst.msk [vmem:[#allocation2 + $0x18] sm:$0xff] %vm19_vm0, %v117_v14 }
  0xe3   :  { %119 = vst.msk [vmem:[#allocation2 + $0x8] sm:$0xff] %vm19_vm0, %v115_v16 }
  0xe7   :  { %v127_v18 = vld [vmem:[#allocation2 + $0x10] sm:$0xff] }
  0xe8   :  { %v138_v19 = vadd.f32 %v171_v17, %v127_v18  ;;  %v125_v20 = vld [vmem:[#allocation2] sm:$0xff] }
  0xe9   :  { %v136_v21 = vadd.f32 %v171_v17, %v125_v20  ;;  %v128_v22 = vld [vmem:[#allocation2 + $0x18] sm:$0xff] }
  0xea   :  { %v178_v23 = vpack.c.bf16 %v138_v19, %v138_v19  ;;  %v139_v24 = vadd.f32 %v171_v17, %v128_v22  ;;  %v126_v25 = vld [vmem:[#allocation2 + $0x8] sm:$0xff] }
  0xeb   :  { %v176_v26 = vpack.c.bf16 %v136_v21, %v136_v21  ;;  %v137_v27 = vadd.f32 %v171_v17, %v126_v25 }
  0xec   :  { %159 = vst.msk [vmem:[%s258_s3 + $0x8] sm:$0xf] %vm156_vm1, %v178_v23  ;;  %v179_v28 = vpack.c.bf16 %v139_v24, %v139_v24 }
  0xed   :  { %157 = vst.msk [vmem:[%s258_s3] sm:$0xf] %vm156_vm1, %v176_v26  ;;  %v177_v29 = vpack.c.bf16 %v137_v27, %v137_v27 }
  0xee   :  { %160 = vst.msk [vmem:[%s258_s3 + $0xc] sm:$0xf] %vm156_vm1, %v179_v28 }
  0xef   :  { %158 = vst.msk [vmem:[%s258_s3 + $0x4] sm:$0xf] %vm156_vm1, %v177_v29 }

// kernel: reformer_autoregressive_forward.13
= control target key start
LH: loop header
LB: loop body
LE: loop exit
PB: predicated region body
PF: predicated region fallthrough
CT: control target
= control target key end

     0   :  { %s1601_s12 = smov 0   ;;  %s1603_s13 = smov 0   ;;  %s1922_s0 = inlined_call_operand.vmem [shape: bf16[2,4,16,8], index: 0, kind: input, shape index: {}]   ;;  %s1923_s1 = inlined_call_operand.vmem [shape: bf16[2,4,16,8], index: 1, kind: input, shape index: {}]   ;;  %s1924_s2 = inlined_call_operand.vmem [shape: bf16[2,4,16,8], index: 2, kind: input, shape index: {}]   ;;  %s1925_s3 = inlined_call_operand.vmem [shape: bf16[2,4,16,8], index: 3, kind: output, shape index: {}]  }
   0x1   :  { %s1605_s14 = smov 0  }
   0x2 LB: > { %s32_s15 = sadd.s32 1, %s1571_s13  ;;  %p1352_p0 = scmp.ge.s32.totalorder %s1575_s14, 1  ;;  %s1575_s14 = sphi %s1605_s14, %s13_s14   ;;  %s1571_s13 = sphi %s1603_s13, %s1927_s13   ;;  %s1567_s12 = sphi %s1601_s12, %s1926_s12  }
   0x3   : > { %p34_p1 = scmp.ge.s32.totalorder %s32_s15, 2  ;;  %p215_p2 = scmp.lt.s32.totalorder %s1575_s14, 3 }
   0x5   : > { %s1929_s15 = smov (%p34_p1, %s32_s15), 0  ;;  %p216_p3 = pnand %p1352_p0, %p215_p2 }
   0x6   : > { %p270_p4 = scmp.lt.s32.totalorder (!%p216_p3), %s1567_s12, 1  ;;  %vm340_vm0 = vcmask (!%p216_p3), 64512   ;;  %v1577_v0 = vmov (!%p216_p3), 0.0   ;;  %vm1578_vm1 = vmmov (!%p216_p3), 0   ;;  %vm323_vm2 = vcmask (!%p216_p3), 7168  }
   0x7   : > { %219 = sbr.rel (%p216_p3) target bundleno = 848 (0x350), region = 32  ;;  %1419 = vmatprep.subr.bf16.mxu0 (!%p216_p3), %v1577_v0  ;;  %1425 = vmatprep.subr.bf16.mxu1 (!%p216_p3), %v1577_v0  ;;  %341 = vst.msk [vmem:[#allocation4] sm:$0xff] (!%p216_p3), %vm340_vm0, %v1577_v0  ;;  %342 = vst.msk [vmem:[#allocation4 + $0x8] sm:$0xff] (!%p216_p3), %vm340_vm0, %v1577_v0  ;;  %v1579_v29 = vmov (!%p216_p3), -inf   ;;  %v607_v30 = vlaneseq (!%p216_p3)  ;;  %vm636_vm4 = vcmask (!%p216_p3), 130048   ;;  %vm1213_vm6 = vcmask (!%p216_p3), 60416  }
   0x8   : > { %343 = vst.msk [vmem:[#allocation4 + $0x10] sm:$0xff] (!%p216_p3), %vm340_vm0, %v1577_v0  ;;  %344 = vst.msk [vmem:[#allocation4 + $0x18] sm:$0xff] (!%p216_p3), %vm340_vm0, %v1577_v0  ;;  %1421 = vmatprep.mubr.msk.bf16.mxu0 (!%p216_p3), %vm1578_vm1, %v1577_v0  ;;  %1427 = vmatprep.mubr.msk.bf16.mxu1 (!%p216_p3), %vm1578_vm1, %v1577_v0 }
   0x9   : > { %345 = vst.msk [vmem:[#allocation4 + $0x20] sm:$0xff] (!%p216_p3), %vm340_vm0, %v1577_v0  ;;  %346 = vst.msk [vmem:[#allocation4 + $0x28] sm:$0xff] (!%p216_p3), %vm340_vm0, %v1577_v0  ;;  %v608_v31 = vshrl.u32 (!%p216_p3), %v607_v30, 7  ;;  %v615_v32 = vand.u32 (!%p216_p3), 127, %v607_v30 }
   0xa   : > { %347 = vst.msk [vmem:[#allocation4 + $0x30] sm:$0xff] (!%p216_p3), %vm340_vm0, %v1577_v0  ;;  %348 = vst.msk [vmem:[#allocation4 + $0x38] sm:$0xff] (!%p216_p3), %vm340_vm0, %v1577_v0 }
   0xb   : > { %326 = vst.msk [vmem:[#allocation2 + $0x10] sm:$0xff] (!%p216_p3), %vm323_vm2, %v1579_v29  ;;  %324 = vst.msk [vmem:[#allocation2] sm:$0xff] (!%p216_p3), %vm323_vm2, %v1579_v29  ;;  %v609_v33 = vadd.s32 (!%p216_p3), 8, %v608_v31  ;;  %vm618_vm3 = vcmp.le.s32.totalorder (!%p216_p3), %v615_v32, %v608_v31 }
   0xc   : > { %325 = vst.msk [vmem:[#allocation2 + $0x8] sm:$0xff] (!%p216_p3), %vm323_vm2, %v1579_v29  ;;  %327 = vst.msk [vmem:[#allocation2 + $0x18] sm:$0xff] (!%p216_p3), %vm323_vm2, %v1579_v29 }
   0xd   : > { %328 = vst.msk [vmem:[#allocation2 + $0x20] sm:$0xff] (!%p216_p3), %vm323_vm2, %v1579_v29  ;;  %329 = vst.msk [vmem:[#allocation2 + $0x28] sm:$0xff] (!%p216_p3), %vm323_vm2, %v1579_v29  ;;  %vm619_vm5 = vcmp.le.s32.totalorder (!%p216_p3), %v615_v32, %v609_v33 }
   0xe   : > { %s1931_s12 = smov (!%p270_p4, %s1567_s12), 1  ;;  %330 = vst.msk [vmem:[#allocation2 + $0x30] sm:$0xff] %vm323_vm2, %v1579_v29  ;;  %331 = vst.msk [vmem:[#allocation2 + $0x38] sm:$0xff] %vm323_vm2, %v1579_v29 }
   0xf   : > { %s1641_s16 = sshll.u32 %s1931_s12, 5  ;;  %332 = vst.msk [vmem:[#allocation3] sm:$0xff] %vm323_vm2, %v1577_v0  ;;  %333 = vst.msk [vmem:[#allocation3 + $0x8] sm:$0xff] %vm323_vm2, %v1577_v0 }
  0x10   : > { %s289_s19 = scalar_lea.vmem %s1923_s1, %s1641_s16  ;;  %s277_s22 = scalar_lea.vmem %s1922_s0, %s1641_s16  ;;  %334 = vst.msk [vmem:[#allocation3 + $0x10] sm:$0xff] %vm323_vm2, %v1577_v0  ;;  %335 = vst.msk [vmem:[#allocation3 + $0x18] sm:$0xff] %vm323_vm2, %v1577_v0 }
  0x11   : > { %v1497_v1 = vld [vmem:[%s289_s19] sm:$0xff]   ;;  %v1498_v2 = vld [vmem:[%s289_s19 + $0x8] sm:$0xff]   ;;  %v1499_v6 = vld [vmem:[%s289_s19 + $0x10] sm:$0xff]   ;;  %336 = vst.msk [vmem:[#allocation3 + $0x20] sm:$0xff] %vm323_vm2, %v1577_v0  ;;  %s1816_s25 = scalar_lea.vmem %s1924_s2, %s1641_s16  ;;  %s1895_s28 = scalar_lea.vmem %s1925_s3, %s1641_s16 }
  0x12   : > { %v392_v3 = vsel %vm340_vm0, %v1497_v1, 0  ;;  %v353_v4 = vld [vmem:[%s277_s22] sm:$0xf]  ;;  %v354_v5 = vld [vmem:[%s277_s22 + $0x4] sm:$0xf]  ;;  %v449_v7 = vsel %vm340_vm0, %v1498_v2, 0 }
  0x13   : > { %1420 = vmatpush3.bf16.xpose.msra.mxu0 %v392_v3  ;;  %v361_v8 = vmul.bf16 1052065461, %v353_v4  ;;  %v362_v9 = vmul.bf16 1052065461, %v354_v5  ;;  %v1500_v10 = vld [vmem:[%s289_s19 + $0x18] sm:$0xff]   ;;  %1426 = vmatpush3.bf16.xpose.msra.mxu1 %v449_v7  ;;  %v506_v19 = vsel %vm340_vm0, %v1499_v6, 0 }
  0x14   : > { %v355_v11 = vld [vmem:[%s277_s22 + $0x8] sm:$0xf]  ;;  %v356_v12 = vld [vmem:[%s277_s22 + $0xc] sm:$0xf]  ;;  %1431 = vmatprep.subr.bf16.mxu0 %v1577_v0  ;;  %1437 = vmatprep.subr.bf16.mxu1 %v1577_v0  ;;  %v357_v17 = vld [vmem:[%s277_s22 + $0x10] sm:$0xf] }
  0x15   : > { %v363_v13 = vmul.bf16 1052065461, %v355_v11  ;;  %v364_v14 = vmul.bf16 1052065461, %v356_v12  ;;  %v1361_v15 = vcombine.low %v361_v8, %v362_v9  ;;  %v358_v18 = vld [vmem:[%s277_s22 + $0x14] sm:$0xf] }
  0x16   : > { %v359_v20 = vld [vmem:[%s277_s22 + $0x18] sm:$0xf]  ;;  %v360_v21 = vld [vmem:[%s277_s22 + $0x1c] sm:$0xf]  ;;  %v563_v22 = vsel %vm340_vm0, %v1500_v10, 0  ;;  %337 = vst.msk [vmem:[#allocation3 + $0x28] sm:$0xff] %vm323_vm2, %v1577_v0 }
  0x17   : > { %v1364_v16 = vcombine.low %v363_v13, %v364_v14  ;;  %v365_v23 = vmul.bf16 1052065461, %v357_v17  ;;  %v366_v24 = vmul.bf16 1052065461, %v358_v18  ;;  %v367_v25 = vmul.bf16 1052065461, %v359_v20 }
  0x18   : > { %v368_v26 = vmul.bf16 1052065461, %v360_v21  ;;  %338 = vst.msk [vmem:[#allocation3 + $0x30] sm:$0xff] %vm323_vm2, %v1577_v0  ;;  %339 = vst.msk [vmem:[#allocation3 + $0x38] sm:$0xff] %vm323_vm2, %v1577_v0  ;;  %v1580_v3 = vmov 0   ;;  %v1735_v4 = vld [vmem:[#allocation2] sm:$0xff] }
  0x19   : > { %v1367_v27 = vcombine.low %v365_v23, %v366_v24  ;;  %1496 = vset.pattern.permute.xlu1 %v1580_v3  ;;  %1495 = vset.pattern.permute.xlu0 %v1580_v3  ;;  %v1737_v5 = vld [vmem:[#allocation2 + $0x10] sm:$0xff]  ;;  %v1745_v10 = vld [vmem:[#allocation2 + $0x8] sm:$0xff]  ;;  %v1752_v12 = vld [vmem:[#allocation2 + $0x18] sm:$0xff] }
  0x1a   : > { %1422 = vmatmul.mubr.msk.bf16.vlgmr.msra.gmra.mrb[0].mxu0 %vm340_vm0, %v1361_v15  ;;  %1428 = vmatmul.mubr.msk.bf16.vlgmr.msra.gmra.mrb[0].mxu1 %vm340_vm0, %v1364_v16  ;;  %v1370_v28 = vcombine.low %v367_v25, %v368_v26  ;;  %v1765_v18 = vld [vmem:[#allocation2 + $0x20] sm:$0xff]  ;;  %v1781_v25 = vld [vmem:[#allocation2 + $0x30] sm:$0xff]  ;;  %v1791_v29 = vld [vmem:[#allocation2 + $0x38] sm:$0xff] }
  0x1b   : > { %1432 = vmatpush3.bf16.xpose.msra.mxu0 %v506_v19  ;;  %1438 = vmatpush3.bf16.xpose.msra.mxu1 %v563_v22  ;;  %v1776_v22 = vld [vmem:[#allocation2 + $0x28] sm:$0xff] }
  0x1c   : > { %1433 = vmatprep.mubr.msk.bf16.mxu0 %vm1578_vm1, %v1577_v0  ;;  %1439 = vmatprep.mubr.msk.bf16.mxu1 %vm1578_vm1, %v1577_v0 }
  0x1d   : > { %1443 = vmatprep.subr.bf16.mxu0 %v1577_v0  ;;  %1449 = vmatprep.subr.bf16.mxu1 %v1577_v0 }
  0x22   : > { %1434 = vmatmul.mubr.msk.bf16.vlgmr.msra.gmra.mrb[4].mxu0 %vm340_vm0, %v1367_v27  ;;  %1440 = vmatmul.mubr.msk.bf16.vlgmr.msra.gmra.mrb[4].mxu1 %vm340_vm0, %v1370_v28 }
  0x23   : > { %1445 = vmatprep.mubr.msk.bf16.mxu0 %vm1578_vm1, %v1577_v0  ;;  %1451 = vmatprep.mubr.msk.bf16.mxu1 %vm1578_vm1, %v1577_v0 }
  0xed   : > { %v428_v34 = vpop.f32.mrb[0].mxu0  ;;  %v485_v36 = vpop.f32.mrb[0].mxu1 }
  0xee   : > { %v1696_v35 = vsel %vm618_vm3, %v428_v34, -1e+30  ;;  %v1423_v37 = vpop.f32.mrb[1].mxu0  ;;  %v1699_v38 = vsel %vm618_vm3, %v485_v36, -1e+30  ;;  %v1429_v39 = vpop.f32.mrb[1].mxu1 }
  0xef   : > { %v431_v40 = vpop.f32.mrb[2].mxu0  ;;  %v637_v41 = vsel %vm636_vm4, %v1696_v35, -inf  ;;  %v488_v43 = vpop.f32.mrb[2].mxu1  ;;  %v643_v44 = vsel %vm636_vm4, %v1699_v38, -inf  ;;  %v1501_v37 = vld [vmem:[%s1816_s25] sm:$0xff]   ;;  %v1502_v39 = vld [vmem:[%s1816_s25 + $0x8] sm:$0xff]  }
  0xf0   : > { %v1704_v42 = vsel %vm619_vm5, %v431_v40, -1e+30  ;;  %638 = vmax.xlane.f32.xlu0 %v637_v41  ;;  %v1424_v45 = vpop.f32.mrb[3].mxu0  ;;  %v1709_v46 = vsel %vm619_vm5, %v488_v43, -1e+30  ;;  %644 = vmax.xlane.f32.xlu1 %v643_v44  ;;  %v1430_v47 = vpop.f32.mrb[3].mxu1 }
  0xf1   : > { %v640_v48 = vsel %vm636_vm4, %v1704_v42, -inf  ;;  %v646_v49 = vsel %vm636_vm4, %v1709_v46, -inf  ;;  %1444 = vmatpush3.bf16.msra.mxu0 %v1501_v37  ;;  %1450 = vmatpush3.bf16.msra.mxu1 %v1502_v39 }
  0xf2   : > { %1455 = vmatprep.subr.bf16.mxu0 %v1577_v0  ;;  %1461 = vmatprep.subr.bf16.mxu1 %v1577_v0 }
  0xf4   : > { %641 = vmax.xlane.f32.xlu0 %v640_v48  ;;  %647 = vmax.xlane.f32.xlu1 %v646_v49 }
  0xf5   : > { %v542_v50 = vpop.f32.mrb[4].mxu0  ;;  %v599_v53 = vpop.f32.mrb[4].mxu1 }
  0xf6   : > { %v1716_v51 = vsel %vm618_vm3, %v542_v50, -1e+30  ;;  %v1435_v52 = vpop.f32.mrb[5].mxu0  ;;  %v1719_v55 = vsel %vm618_vm3, %v599_v53, -1e+30  ;;  %v1441_v56 = vpop.f32.mrb[5].mxu1 }
  0xf7   : > { %v545_v54 = vpop.f32.mrb[6].mxu0  ;;  %v649_v57 = vsel %vm636_vm4, %v1716_v51, -inf  ;;  %v602_v60 = vpop.f32.mrb[6].mxu1  ;;  %v655_v1 = vsel %vm636_vm4, %v1719_v55, -inf }
  0xf8   : > { %v1724_v58 = vsel %vm619_vm5, %v545_v54, -1e+30  ;;  %v1436_v59 = vpop.f32.mrb[7].mxu0  ;;  %650 = vmax.xlane.f32.xlu0 %v649_v57  ;;  %v1727_v61 = vsel %vm619_vm5, %v602_v60, -1e+30  ;;  %v1442_v63 = vpop.f32.mrb[7].mxu1 }
  0xf9   : > { %v652_v62 = vsel %vm636_vm4, %v1724_v58, -inf  ;;  %v658_v2 = vsel %vm636_vm4, %v1727_v61, -inf }
  0xfa   : > { %653 = vmax.xlane.f32.xlu1 %v652_v62 }
  0xfc   : > { %656 = vmax.xlane.f32.xlu0 %v655_v1 }
  0xfe   : > { %659 = vmax.xlane.f32.xlu1 %v658_v2  ;;  %v1503_v2 = vld [vmem:[%s1816_s25 + $0x10] sm:$0xff]  }
 0x17d   : > { %v639_v6 = vpop.xlane.xlu0 %638  ;;  %v645_v7 = vpop.xlane.xlu1 %644 }
 0x17e   : > { %v1740_v8 = vmax.f32 %v1735_v4, %v639_v6  ;;  %v1743_v9 = vmax.f32 %v1737_v5, %v645_v7 }
 0x180   : > { %v669_v11 = vsub.f32 %v1735_v4, %v1740_v8  ;;  %1098 = vst.msk [vmem:[#allocation2] sm:$0xff] %vm323_vm2, %v1740_v8  ;;  %695 = vperm.xlu0 %1495, %v1740_v8   ;;  %v671_v13 = vsub.f32 %v1737_v5, %v1743_v9  ;;  %1100 = vst.msk [vmem:[#allocation2 + $0x10] sm:$0xff] %vm323_vm2, %v1743_v9  ;;  %705 = vperm.xlu1 %1496, %v1743_v9  }
 0x181   : > { %v642_v14 = vpop.xlane.xlu0 %641  ;;  %v648_v15 = vpop.xlane.xlu1 %647 }
 0x182   : > { %v1760_v16 = vmax.f32 %v1745_v10, %v642_v14  ;;  %v1763_v17 = vmax.f32 %v1752_v12, %v648_v15  ;;  %v681_v4 = vmul.f32 1.442695, %v671_v13 }
 0x184   : > { %v670_v19 = vsub.f32 %v1745_v10, %v1760_v16  ;;  %1099 = vst.msk [vmem:[#allocation2 + $0x8] sm:$0xff] %vm323_vm2, %v1760_v16  ;;  %v672_v20 = vsub.f32 %v1752_v12, %v1763_v17  ;;  %1101 = vst.msk [vmem:[#allocation2 + $0x18] sm:$0xff] %vm323_vm2, %v1763_v17  ;;  %700 = vperm.xlu1 %1496, %v1760_v16  }
 0x185   : > { %v651_v21 = vpop.xlane.xlu0 %650 }
 0x186   : > { %v1779_v23 = vmax.f32 %v1765_v18, %v651_v21 }
 0x187   : > { %v654_v24 = vpop.xlane.xlu1 %653 }
 0x188   : > { %v673_v26 = vsub.f32 %v1765_v18, %v1779_v23  ;;  %1102 = vst.msk [vmem:[#allocation2 + $0x20] sm:$0xff] %vm323_vm2, %v1779_v23  ;;  %v1788_v27 = vmax.f32 %v1776_v22, %v654_v24  ;;  %710 = vperm.xlu1 %1496, %v1763_v17  }
 0x189   : > { %v657_v28 = vpop.xlane.xlu0 %656 }
 0x18a   : > { %v674_v30 = vsub.f32 %v1776_v22, %v1788_v27  ;;  %1103 = vst.msk [vmem:[#allocation2 + $0x28] sm:$0xff] %vm323_vm2, %v1788_v27  ;;  %v1798_v31 = vmax.f32 %v1781_v25, %v657_v28  ;;  %v685_v10 = vmul.f32 1.442695, %v673_v26  ;;  %v757_v22 = vld [vmem:[#allocation3] sm:$0xff] }
 0x18b   : > { %v660_v32 = vpop.xlane.xlu1 %659 }
 0x18c   : > { %v675_v33 = vsub.f32 %v1781_v25, %v1798_v31  ;;  %1104 = vst.msk [vmem:[#allocation2 + $0x30] sm:$0xff] %vm323_vm2, %v1798_v31  ;;  %v1805_v34 = vmax.f32 %v1791_v29, %v660_v32  ;;  %715 = vperm.xlu1 %1496, %v1779_v23   ;;  %v687_v8 = vmul.f32 1.442695, %v674_v30  ;;  %v759_v23 = vld [vmem:[#allocation3 + $0x10] sm:$0xff] }
 0x18e   : > { %v676_v36 = vsub.f32 %v1791_v29, %v1805_v34  ;;  %1105 = vst.msk [vmem:[#allocation2 + $0x38] sm:$0xff] %vm323_vm2, %v1805_v34  ;;  %v689_v5 = vmul.f32 1.442695, %v675_v33 }
 0x190   : > { %725 = vperm.xlu1 %1496, %v1798_v31   ;;  %v758_v31 = vld [vmem:[#allocation3 + $0x8] sm:$0xff] }
 0x194   : > { %720 = vperm.xlu1 %1496, %v1788_v27  }
 0x198   : > { %730 = vperm.xlu1 %1496, %v1805_v34  }
 0x1ff   : > { %v696_v40 = vpop.permute.xlu0 %695  ;;  %v706_v43 = vpop.permute.xlu1 %705 }
 0x200   : > { %v733_v41 = vsub.f32 %v1696_v35, %v696_v40  ;;  %v735_v44 = vsub.f32 %v1699_v38, %v706_v43 }
 0x202   : > { %v741_v45 = vmul.f32 1.442695, %v733_v41  ;;  %v745_v47 = vmul.f32 1.442695, %v735_v44 }
 0x203   : > { %v701_v48 = vpop.permute.xlu1 %700 }
 0x204   : > { %1505 = vpow2.f32 %v741_v45  ;;  %v734_v49 = vsub.f32 %v1704_v42, %v701_v48 }
 0x205   : > { %1507 = vpow2.f32 %v745_v47 }
 0x206   : > { %v743_v50 = vmul.f32 1.442695, %v734_v49  ;;  %v679_v49 = vmul.f32 1.442695, %v670_v19 }
 0x207   : > { %v711_v52 = vpop.permute.xlu1 %710 }
 0x208   : > { %1509 = vpow2.f32 %v743_v50  ;;  %v736_v53 = vsub.f32 %v1709_v46, %v711_v52  ;;  %v683_v50 = vmul.f32 1.442695, %v672_v20  ;;  %v760_v52 = vld [vmem:[#allocation3 + $0x18] sm:$0xff] }
 0x20a   : > { %v747_v54 = vmul.f32 1.442695, %v736_v53 }
 0x20b   : > { %v716_v56 = vpop.permute.xlu1 %715 }
 0x20c   : > { %1511 = vpow2.f32 %v747_v54  ;;  %v737_v35 = vsub.f32 %v1716_v51, %v716_v56 }
 0x20e   : > { %v1506_v57 = vpop.eup %1505  ;;  %v749_v59 = vmul.f32 1.442695, %v737_v35  ;;  %v761_v35 = vld [vmem:[#allocation3 + $0x20] sm:$0xff] }
 0x20f   : > { %v1508_v38 = vpop.eup %1507  ;;  %v773_v60 = vsel %vm636_vm4, %v1506_v57, 0.0  ;;  %v726_v62 = vpop.permute.xlu1 %725 }
 0x210   : > { %774 = vadd.xlane.f32.xlu1 %v773_v60  ;;  %v779_v42 = vsel %vm636_vm4, %v1508_v38, 0.0  ;;  %1513 = vpow2.f32 %v749_v59  ;;  %v739_v63 = vsub.f32 %v1719_v55, %v726_v62  ;;  %v1504_v55 = vld [vmem:[%s1816_s25 + $0x18] sm:$0xff]  }
 0x211   : > { %780 = vadd.xlane.f32.xlu0 %v779_v42  ;;  %v763_v42 = vld [vmem:[#allocation3 + $0x30] sm:$0xff] }
 0x212   : > { %v1510_v46 = vpop.eup %1509  ;;  %v753_v1 = vmul.f32 1.442695, %v739_v63 }
 0x213   : > { %v721_v3 = vpop.permute.xlu1 %720  ;;  %v776_v51 = vsel %vm636_vm4, %v1510_v46, 0.0  ;;  %v870_v6 = vpack.c.bf16 %v1510_v46, %v1506_v57 }
 0x214   : > { %1515 = vpow2.f32 %v753_v1  ;;  %v738_v7 = vsub.f32 %v1724_v58, %v721_v3  ;;  %v762_v3 = vld [vmem:[#allocation3 + $0x28] sm:$0xff] }
 0x215   : > { %777 = vadd.xlane.f32.xlu0 %v776_v51  ;;  %1446 = vmatmul.mubr.msk.bf16.vlgmr.msra.gmra.mrb[8].mxu0 %vm636_vm4, %v870_v6 }
 0x216   : > { %v1512_v14 = vpop.eup %1511  ;;  %v751_v15 = vmul.f32 1.442695, %v738_v7  ;;  %1456 = vmatpush3.bf16.msra.mxu0 %v1503_v2  ;;  %1457 = vmatprep.mubr.msk.bf16.mxu0 %vm1578_vm1, %v1577_v0 }
 0x217   : > { %v731_v21 = vpop.permute.xlu1 %730  ;;  %v782_v24 = vsel %vm636_vm4, %v1512_v14, 0.0  ;;  %v871_v28 = vpack.c.bf16 %v1512_v14, %v1508_v38 }
 0x218   : > { %1517 = vpow2.f32 %v751_v15  ;;  %v740_v32 = vsub.f32 %v1727_v61, %v731_v21  ;;  %783 = vadd.xlane.f32.xlu1 %v782_v24 }
 0x219   : > { %1452 = vmatmul.mubr.msk.bf16.vlgmr.msra.gmra.mrb[8].mxu1 %vm636_vm4, %v871_v28 }
 0x21a   : > { %v1514_v58 = vpop.eup %1513  ;;  %v755_v37 = vmul.f32 1.442695, %v740_v32  ;;  %1462 = vmatpush3.bf16.msra.mxu1 %v1504_v55  ;;  %1463 = vmatprep.mubr.msk.bf16.mxu1 %vm1578_vm1, %v1577_v0  ;;  %v677_v0 = vmul.f32 1.442695, %v669_v11  ;;  %v691_v11 = vmul.f32 1.442695, %v676_v36 }
 0x21b   : > { %v785_v39 = vsel %vm636_vm4, %v1514_v58, 0.0  ;;  %v764_v55 = vld [vmem:[#allocation3 + $0x38] sm:$0xff] }
 0x21c   : > { %1519 = vpow2.f32 %v755_v37  ;;  %786 = vadd.xlane.f32.xlu0 %v785_v39 }
 0x21d   : > { %1521 = vpow2.f32 %v677_v0 }
 0x21e   : > { %v1516_v40 = vpop.eup %1515  ;;  %1523 = vpow2.f32 %v679_v49  ;;  %v814_v49 = vld [vmem:[#allocation4] sm:$0xff] }
 0x21f   : > { %v791_v41 = vsel %vm636_vm4, %v1516_v40, 0.0  ;;  %1525 = vpow2.f32 %v683_v50 }
 0x220   : > { %792 = vadd.xlane.f32.xlu0 %v791_v41  ;;  %1527 = vpow2.f32 %v681_v4  ;;  %v815_v4 = vld [vmem:[#allocation4 + $0x8] sm:$0xff] }
 0x221   : > { %1529 = vpow2.f32 %v687_v8 }
 0x222   : > { %v1518_v43 = vpop.eup %1517  ;;  %1531 = vpow2.f32 %v685_v10  ;;  %v816_v10 = vld [vmem:[#allocation4 + $0x10] sm:$0xff] }
 0x223   : > { %v788_v61 = vsel %vm636_vm4, %v1518_v43, 0.0  ;;  %v872_v44 = vpack.c.bf16 %v1518_v43, %v1514_v58  ;;  %1533 = vpow2.f32 %v691_v11 }
 0x224   : > { %789 = vadd.xlane.f32.xlu1 %v788_v61  ;;  %1535 = vpow2.f32 %v689_v5 }
 0x225   : > { %1458 = vmatmul.mubr.msk.bf16.vlgmr.msra.gmra.mrb[12].mxu0 %vm636_vm4, %v872_v44 }
 0x226   : > { %v1520_v45 = vpop.eup %1519 }
 0x227   : > { %v794_v47 = vsel %vm636_vm4, %v1520_v45, 0.0  ;;  %v873_v48 = vpack.c.bf16 %v1520_v45, %v1516_v40  ;;  %v1522_v12 = vpop.eup %1521 }
 0x228   : > { %795 = vadd.xlane.f32.xlu1 %v794_v47  ;;  %v1524_v9 = vpop.eup %1523  ;;  %v765_v25 = vmul.f32 %v1522_v12, %v757_v22 }
 0x229   : > { %1464 = vmatmul.mubr.msk.bf16.vlgmr.msra.gmra.mrb[12].mxu1 %vm636_vm4, %v873_v48  ;;  %v1526_v13 = vpop.eup %1525  ;;  %v766_v34 = vmul.f32 %v1524_v9, %v758_v31 }
 0x22a   : > { %v1528_v16 = vpop.eup %1527  ;;  %v768_v54 = vmul.f32 %v1526_v13, %v760_v52  ;;  %v819_v52 = vld [vmem:[#allocation4 + $0x28] sm:$0xff] }
 0x22b   : > { %v1530_v17 = vpop.eup %1529  ;;  %v767_v26 = vmul.f32 %v1528_v16, %v759_v23 }
 0x22c   : > { %v1532_v18 = vpop.eup %1531  ;;  %v770_v7 = vmul.f32 %v1530_v17, %v762_v3 }
 0x22d   : > { %v1534_v19 = vpop.eup %1533  ;;  %v769_v59 = vmul.f32 %v1532_v18, %v761_v35 }
 0x22e   : > { %v1536_v20 = vpop.eup %1535  ;;  %v772_v28 = vmul.f32 %v1534_v19, %v764_v55 }
 0x22f   : > { %v771_v1 = vmul.f32 %v1536_v20, %v763_v42 }
 0x236   : > { %824 = vperm.xlu0 %1495, %v1522_v12  }
 0x239   : > { %829 = vperm.xlu1 %1496, %v1524_v9  }
 0x23a   : > { %839 = vperm.xlu0 %1495, %v1526_v13  }
 0x23d   : > { %834 = vperm.xlu1 %1496, %v1528_v16   ;;  %v817_v16 = vld [vmem:[#allocation4 + $0x18] sm:$0xff] }
 0x23e   : > { %849 = vperm.xlu0 %1495, %v1530_v17  }
 0x241   : > { %844 = vperm.xlu1 %1496, %v1532_v18  }
 0x242   : > { %859 = vperm.xlu0 %1495, %v1534_v19  }
 0x245   : > { %854 = vperm.xlu1 %1496, %v1536_v20  }
 0x29d   : > { %v775_v27 = vpop.xlane.xlu1 %774 }
 0x29e   : > { %v781_v29 = vpop.xlane.xlu0 %780  ;;  %v797_v30 = vadd.f32 %v775_v27, %v765_v25 }
 0x29f   : > { %v799_v33 = vadd.f32 %v781_v29, %v767_v26 }
 0x2a0   : > { %806 = vst.msk [vmem:[#allocation3] sm:$0xff] %vm323_vm2, %v797_v30 }
 0x2a1   : > { %808 = vst.msk [vmem:[#allocation3 + $0x10] sm:$0xff] %vm323_vm2, %v799_v33 }
 0x2a2   : > { %v778_v36 = vpop.xlane.xlu0 %777 }
 0x2a3   : > { %v798_v53 = vadd.f32 %v778_v36, %v766_v34  ;;  %v818_v36 = vld [vmem:[#allocation4 + $0x20] sm:$0xff] }
 0x2a5   : > { %807 = vst.msk [vmem:[#allocation3 + $0x8] sm:$0xff] %vm323_vm2, %v798_v53  ;;  %v784_v56 = vpop.xlane.xlu1 %783 }
 0x2a6   : > { %v800_v57 = vadd.f32 %v784_v56, %v768_v54  ;;  %v820_v54 = vld [vmem:[#allocation4 + $0x30] sm:$0xff] }
 0x2a7   : > { %v1109_v38 = vld [vmem:[#allocation3] sm:$0xff] }
 0x2a8   : > { %1537 = vrcp.f32 %v1109_v38  ;;  %809 = vst.msk [vmem:[#allocation3 + $0x18] sm:$0xff] %vm323_vm2, %v800_v57  ;;  %v1111_v60 = vld [vmem:[#allocation3 + $0x10] sm:$0xff] }
 0x2a9   : > { %v787_v62 = vpop.xlane.xlu0 %786  ;;  %1539 = vrcp.f32 %v1111_v60  ;;  %v821_v60 = vld [vmem:[#allocation4 + $0x38] sm:$0xff] }
 0x2aa   : > { %v801_v63 = vadd.f32 %v787_v62, %v769_v59 }
 0x2ac   : > { %v1110_v46 = vld [vmem:[#allocation3 + $0x8] sm:$0xff]  ;;  %810 = vst.msk [vmem:[#allocation3 + $0x20] sm:$0xff] %vm323_vm2, %v801_v63 }
 0x2ad   : > { %1541 = vrcp.f32 %v1110_v46  ;;  %v793_v2 = vpop.xlane.xlu0 %792 }
 0x2ae   : > { %v803_v51 = vadd.f32 %v793_v2, %v771_v1 }
 0x2af   : > { %v1112_v6 = vld [vmem:[#allocation3 + $0x18] sm:$0xff] }
 0x2b0   : > { %812 = vst.msk [vmem:[#allocation3 + $0x30] sm:$0xff] %vm323_vm2, %v803_v51  ;;  %1543 = vrcp.f32 %v1112_v6 }
 0x2b1   : > { %v790_v15 = vpop.xlane.xlu1 %789 }
 0x2b2   : > { %v1538_v14 = vpop.eup %1537  ;;  %v802_v21 = vadd.f32 %v790_v15, %v770_v7 }
 0x2b3   : > { %1135 = vperm.xlu1 %1496, %v1538_v14   ;;  %v1113_v24 = vld [vmem:[#allocation3 + $0x20] sm:$0xff]  ;;  %v1540_v32 = vpop.eup %1539 }
 0x2b4   : > { %811 = vst.msk [vmem:[#allocation3 + $0x28] sm:$0xff] %vm323_vm2, %v802_v21  ;;  %1545 = vrcp.f32 %v1113_v24 }
 0x2b5   : > { %v796_v58 = vpop.xlane.xlu1 %795  ;;  %v825_v50 = vpop.permute.xlu0 %824 }
 0x2b6   : > { %v804_v39 = vadd.f32 %v796_v58, %v772_v28  ;;  %v862_v8 = vmul.f32 %v825_v50, %v814_v49 }
 0x2b7   : > { %v1542_v37 = vpop.eup %1541  ;;  %1145 = vperm.xlu1 %1496, %v1540_v32   ;;  %v1115_v40 = vld [vmem:[#allocation3 + $0x30] sm:$0xff] }
 0x2b8   : > { %1140 = vperm.xlu0 %1495, %v1542_v37   ;;  %813 = vst.msk [vmem:[#allocation3 + $0x38] sm:$0xff] %vm323_vm2, %v804_v39  ;;  %1547 = vrcp.f32 %v1115_v40 }
 0x2b9   : > { %v830_v48 = vpop.permute.xlu1 %829  ;;  %v840_v17 = vpop.permute.xlu0 %839 }
 0x2ba   : > { %v1544_v41 = vpop.eup %1543  ;;  %v863_v5 = vmul.f32 %v830_v48, %v815_v4  ;;  %v865_v25 = vmul.f32 %v840_v17, %v817_v16 }
 0x2bb   : > { %v1114_v43 = vld [vmem:[#allocation3 + $0x28] sm:$0xff] }
 0x2bc   : > { %1150 = vperm.xlu0 %1495, %v1544_v41   ;;  %1549 = vrcp.f32 %v1114_v43 }
 0x2bd   : > { %v835_v11 = vpop.permute.xlu1 %834  ;;  %v850_v34 = vpop.permute.xlu0 %849 }
 0x2be   : > { %v1546_v61 = vpop.eup %1545  ;;  %v864_v19 = vmul.f32 %v835_v11, %v816_v10  ;;  %v867_v57 = vmul.f32 %v850_v34, %v819_v52 }
 0x2bf   : > { %1155 = vperm.xlu1 %1496, %v1546_v61   ;;  %v1116_v44 = vld [vmem:[#allocation3 + $0x38] sm:$0xff] }
 0x2c0   : > { %1551 = vrcp.f32 %v1116_v44 }
 0x2c1   : > { %v845_v33 = vpop.permute.xlu1 %844  ;;  %v860_v62 = vpop.permute.xlu0 %859 }
 0x2c2   : > { %v1548_v45 = vpop.eup %1547  ;;  %v866_v53 = vmul.f32 %v845_v33, %v818_v36  ;;  %v869_v3 = vmul.f32 %v860_v62, %v821_v60 }
 0x2c3   : > { %1165 = vperm.xlu1 %1496, %v1548_v45  }
 0x2c5   : > { %v855_v56 = vpop.permute.xlu1 %854 }
 0x2c6   : > { %v1550_v0 = vpop.eup %1549  ;;  %v868_v63 = vmul.f32 %v855_v56, %v820_v54 }
 0x2c7   : > { %1160 = vperm.xlu0 %1495, %v1550_v0  }
 0x2ca   : > { %v1552_v47 = vpop.eup %1551 }
 0x2cb   : > { %1170 = vperm.xlu0 %1495, %v1552_v47  }
 0x2e8   : > { %v925_v12 = vpop.f32.mrb[8].mxu0 }
 0x2e9   : > { %v1082_v9 = vadd.f32 %v925_v12, %v862_v8  ;;  %v1447_v13 = vpop.f32.mrb[9].mxu0 }
 0x2ea   : > { %v928_v18 = vpop.f32.mrb[10].mxu0 }
 0x2eb   : > { %1090 = vst.msk [vmem:[#allocation4] sm:$0xff] %vm340_vm0, %v1082_v9  ;;  %v1083_v20 = vadd.f32 %v928_v18, %v863_v5  ;;  %v1448_v22 = vpop.f32.mrb[11].mxu0 }
 0x2ec   : > { %v975_v23 = vpop.f32.mrb[8].mxu1 }
 0x2ed   : > { %1091 = vst.msk [vmem:[#allocation4 + $0x8] sm:$0xff] %vm340_vm0, %v1083_v20  ;;  %v1084_v26 = vadd.f32 %v975_v23, %v864_v19  ;;  %v1453_v27 = vpop.f32.mrb[9].mxu1 }
 0x2ee   : > { %v978_v29 = vpop.f32.mrb[10].mxu1 }
 0x2ef   : > { %1092 = vst.msk [vmem:[#allocation4 + $0x10] sm:$0xff] %vm340_vm0, %v1084_v26  ;;  %v1085_v30 = vadd.f32 %v978_v29, %v865_v25  ;;  %v1454_v31 = vpop.f32.mrb[11].mxu1 }
 0x2f1   : > { %1093 = vst.msk [vmem:[#allocation4 + $0x18] sm:$0xff] %vm340_vm0, %v1085_v30 }
 0x2f2   : > { %v1125_v21 = vld [vmem:[#allocation4] sm:$0xff] }
 0x2f4   : > { %v1126_v39 = vld [vmem:[#allocation4 + $0x8] sm:$0xff] }
 0x2f6   : > { %v1127_v32 = vld [vmem:[#allocation4 + $0x10] sm:$0xff] }
 0x2f8   : > { %v1025_v35 = vpop.f32.mrb[12].mxu0  ;;  %v1128_v44 = vld [vmem:[#allocation4 + $0x18] sm:$0xff] }
 0x2f9   : > { %v1086_v38 = vadd.f32 %v1025_v35, %v866_v53  ;;  %v1459_v59 = vpop.f32.mrb[13].mxu0 }
 0x2fa   : > { %v1028_v42 = vpop.f32.mrb[14].mxu0 }
 0x2fb   : > { %1094 = vst.msk [vmem:[#allocation4 + $0x20] sm:$0xff] %vm340_vm0, %v1086_v38  ;;  %v1087_v46 = vadd.f32 %v1028_v42, %v867_v57  ;;  %v1460_v1 = vpop.f32.mrb[15].mxu0 }
 0x2fc   : > { %v1075_v2 = vpop.f32.mrb[12].mxu1 }
 0x2fd   : > { %1095 = vst.msk [vmem:[#allocation4 + $0x28] sm:$0xff] %vm340_vm0, %v1087_v46  ;;  %v1088_v51 = vadd.f32 %v1075_v2, %v868_v63  ;;  %v1465_v6 = vpop.f32.mrb[13].mxu1 }
 0x2fe   : > { %v1078_v7 = vpop.f32.mrb[14].mxu1 }
 0x2ff   : > { %1096 = vst.msk [vmem:[#allocation4 + $0x30] sm:$0xff] %vm340_vm0, %v1088_v51  ;;  %v1089_v14 = vadd.f32 %v1078_v7, %v869_v3  ;;  %v1466_v15 = vpop.f32.mrb[15].mxu1 }
 0x301   : > { %1097 = vst.msk [vmem:[#allocation4 + $0x38] sm:$0xff] %vm340_vm0, %v1089_v14 }
 0x302   : > { %v1129_v49 = vld [vmem:[#allocation4 + $0x20] sm:$0xff] }
 0x304   : > { %v1130_v9 = vld [vmem:[#allocation4 + $0x28] sm:$0xff] }
 0x306   : > { %v1131_v8 = vld [vmem:[#allocation4 + $0x30] sm:$0xff] }
 0x308   : > { %v1132_v17 = vld [vmem:[#allocation4 + $0x38] sm:$0xff] }
 0x332   : > { %v1136_v55 = vpop.permute.xlu1 %1135 }
 0x333   : > { %v1173_v24 = vmul.f32 %v1136_v55, %v1125_v21 }
 0x335   : > { %v1395_v28 = vpack.c.bf16 %v1173_v24, %v1173_v24 }
 0x336   : > { %v1146_v58 = vpop.permute.xlu1 %1145 }
 0x337   : > { %1214 = vst.msk [vmem:[%s1895_s28] sm:$0xf] %vm1213_vm6, %v1395_v28  ;;  %v1141_v37 = vpop.permute.xlu0 %1140  ;;  %v1175_v40 = vmul.f32 %v1146_v58, %v1127_v32 }
 0x338   : > { %v1174_v41 = vmul.f32 %v1141_v37, %v1126_v39 }
 0x339   : > { %v1397_v43 = vpack.c.bf16 %v1175_v40, %v1175_v40 }
 0x33a   : > { %v1396_v61 = vpack.c.bf16 %v1174_v41, %v1174_v41 }
 0x33b   : > { %1216 = vst.msk [vmem:[%s1895_s28 + $0x8] sm:$0xf] %vm1213_vm6, %v1397_v43  ;;  %v1151_v45 = vpop.permute.xlu0 %1150 }
 0x33c   : > { %1215 = vst.msk [vmem:[%s1895_s28 + $0x4] sm:$0xf] %vm1213_vm6, %v1396_v61  ;;  %v1176_v0 = vmul.f32 %v1151_v45, %v1128_v44 }
 0x33e   : > { %v1398_v47 = vpack.c.bf16 %v1176_v0, %v1176_v0  ;;  %v1156_v48 = vpop.permute.xlu1 %1155 }
 0x33f   : > { %v1177_v50 = vmul.f32 %v1156_v48, %v1129_v49 }
 0x340   : > { %1217 = vst.msk [vmem:[%s1895_s28 + $0xc] sm:$0xf] %vm1213_vm6, %v1398_v47 }
 0x341   : > { %v1399_v4 = vpack.c.bf16 %v1177_v50, %v1177_v50 }
 0x342   : > { %v1166_v10 = vpop.permute.xlu1 %1165 }
 0x343   : > { %1218 = vst.msk [vmem:[%s1895_s28 + $0x10] sm:$0xf] %vm1213_vm6, %v1399_v4  ;;  %v1179_v11 = vmul.f32 %v1166_v10, %v1131_v8 }
 0x345   : > { %v1401_v12 = vpack.c.bf16 %v1179_v11, %v1179_v11 }
 0x346   : > { %v1161_v5 = vpop.permute.xlu0 %1160 }
 0x347   : > { %1220 = vst.msk [vmem:[%s1895_s28 + $0x18] sm:$0xf] %vm1213_vm6, %v1401_v12  ;;  %v1178_v13 = vmul.f32 %v1161_v5, %v1130_v9 }
 0x349   : > { %v1400_v16 = vpack.c.bf16 %v1178_v13, %v1178_v13 }
 0x34a   : > { %v1171_v18 = vpop.permute.xlu0 %1170 }
 0x34b   : > { %1219 = vst.msk [vmem:[%s1895_s28 + $0x14] sm:$0xf] %vm1213_vm6, %v1400_v16  ;;  %v1180_v19 = vmul.f32 %v1171_v18, %v1132_v17 }
 0x34d   : > { %v1402_v20 = vpack.c.bf16 %v1180_v19, %v1180_v19 }
 0x34f   : > { %1221 = vst.msk [vmem:[%s1895_s28 + $0x1c] sm:$0xf] %vm1213_vm6, %v1402_v20 }
 0x350 PF: > { %s13_s14 = sadd.s32 1, %s1575_s14   ;;  %s1926_s12 = smov %s1571_s13 }
 0x351   : > { %p10_p5 = scmp.ge.s32.totalorder %s13_s14, 4   ;;  %s1927_s13 = smov %s1929_s15 }
 0x353   :  { %12 = sbr.rel (!%p10_p5) target bundleno = 2 (0x2), region = 80 }

// kernel: reformer_autoregressive_forward.15
= control target key start
LH: loop header
LB: loop body
LE: loop exit
PB: predicated region body
PF: predicated region fallthrough
CT: control target
= control target key end

     0   :  { %vm57_vm0 = vcmask 261120   ;;  %s290_s1 = inlined_call_operand.vmem [shape: bf16[32,128], index: 1, kind: input, shape index: {}]   ;;  %s291_s0 = inlined_call_operand.vmem [shape: bf16[32,32], index: 0, kind: input, shape index: {}]   ;;  %s292_s2 = inlined_call_operand.vmem [shape: f32[1,128], index: 2, kind: input, shape index: {}]   ;;  %s293_s3 = inlined_call_operand.vmem [shape: bf16[32,128], index: 3, kind: output, shape index: {}]  }
   0x1   :  { %v237_v0 = vld [vmem:[%s290_s1] sm:$0xff]   ;;  %v238_v1 = vld [vmem:[%s290_s1 + $0x8] sm:$0xff]  }
   0x2   :  { %229 = vmatprep.subr.bf16.mxu0 %v237_v0  ;;  %v239_v2 = vld [vmem:[%s291_s0] sm:$0xff]   ;;  %v240_v3 = vld [vmem:[%s291_s0 + $0x8] sm:$0xff]  }
   0x3   :  { %230 = vmatpush3.bf16.msra.mxu0 %v237_v0  ;;  %233 = vmatprep.mubr.msk.bf16.mxu0 %vm57_vm0, %v239_v2  ;;  %v205_v4 = vld [vmem:[%s292_s2] ss:$0 sm:$0xff] }
   0x4   :  { %231 = vmatprep.subr.bf16.mxu0 %v238_v1 }
   0x7   :  { %232 = vmatpush3.bf16.msra.mxu0 %v238_v1 }
   0xa   :  { %234 = vmatmul.mubr.msk.bf16.vlgmr.msra.gmra.mrb[0].mxu0 %vm57_vm0, %v240_v3 }
  0xdd   :  { %v235_v5 = vpop.f32.mrb[0].mxu0 }
  0xde   :  { %v137_v6 = vadd.f32 %v235_v5, %v205_v4  ;;  %v98_v7 = vpop.f32.mrb[1].mxu0 }
  0xdf   :  { %v135_v8 = vadd.f32 %v205_v4, %v98_v7  ;;  %v236_v9 = vpop.f32.mrb[2].mxu0 }
  0xe0   :  { %v141_v10 = vmul.f32 %v137_v6, %v137_v6  ;;  %v138_v11 = vadd.f32 %v236_v9, %v205_v4  ;;  %v101_v12 = vpop.f32.mrb[3].mxu0 }
  0xe1   :  { %v139_v13 = vmul.f32 %v135_v8, %v135_v8  ;;  %v136_v14 = vadd.f32 %v205_v4, %v101_v12 }
  0xe2   :  { %v145_v15 = vmul.f32 %v141_v10, %v137_v6  ;;  %v142_v16 = vmul.f32 %v138_v11, %v138_v11 }
  0xe3   :  { %v143_v17 = vmul.f32 %v139_v13, %v135_v8  ;;  %v140_v18 = vmul.f32 %v136_v14, %v136_v14 }
  0xe4   :  { %v149_v19 = vmul.f32 0.044715, %v145_v15  ;;  %v146_v20 = vmul.f32 %v142_v16, %v138_v11 }
  0xe5   :  { %v147_v21 = vmul.f32 0.044715, %v143_v17  ;;  %v144_v22 = vmul.f32 %v140_v18, %v136_v14 }
  0xe6   :  { %v153_v23 = vadd.f32 %v149_v19, %v137_v6  ;;  %v150_v24 = vmul.f32 0.044715, %v146_v20 }
  0xe7   :  { %v151_v25 = vadd.f32 %v147_v21, %v135_v8  ;;  %v148_v26 = vmul.f32 0.044715, %v144_v22 }
  0xe8   :  { %v157_v27 = vmul.f32 0.7978846, %v153_v23  ;;  %v154_v28 = vadd.f32 %v150_v24, %v138_v11 }
  0xe9   :  { %v155_v29 = vmul.f32 0.7978846, %v151_v25  ;;  %v152_v30 = vadd.f32 %v148_v26, %v136_v14 }
  0xea   :  { %241 = vtanh.f32 %v157_v27  ;;  %v158_v31 = vmul.f32 0.7978846, %v154_v28 }
  0xeb   :  { %243 = vtanh.f32 %v155_v29  ;;  %v156_v32 = vmul.f32 0.7978846, %v152_v30 }
  0xec   :  { %245 = vtanh.f32 %v158_v31 }
  0xed   :  { %247 = vtanh.f32 %v156_v32 }
  0xf4   :  { %v242_v33 = vpop.eup %241 }
  0xf5   :  { %v244_v34 = vpop.eup %243  ;;  %v165_v35 = vadd.f32 1.0, %v242_v33 }
  0xf6   :  { %v246_v36 = vpop.eup %245  ;;  %v163_v37 = vadd.f32 1.0, %v244_v34 }
  0xf7   :  { %v248_v38 = vpop.eup %247  ;;  %v169_v39 = vmul.f32 0.5, %v165_v35  ;;  %v166_v40 = vadd.f32 1.0, %v246_v36 }
  0xf8   :  { %v167_v41 = vmul.f32 0.5, %v163_v37  ;;  %v164_v42 = vadd.f32 1.0, %v248_v38 }
  0xf9   :  { %v170_v43 = vmul.f32 0.5, %v166_v40  ;;  %v173_v45 = vmul.f32 %v169_v39, %v137_v6 }
  0xfa   :  { %v168_v44 = vmul.f32 0.5, %v164_v42  ;;  %v171_v47 = vmul.f32 %v167_v41, %v135_v8 }
  0xfb   :  { %v174_v46 = vmul.f32 %v170_v43, %v138_v11 }
  0xfc   :  { %v172_v48 = vmul.f32 %v168_v44, %v136_v14 }
  0xfd   :  { %v222_v49 = vpack.c.bf16 %v174_v46, %v173_v45 }
  0xfe   :  { %v217_v50 = vpack.c.bf16 %v172_v48, %v171_v47 }
  0xff   :  { %224 = vst [vmem:[%s293_s3 + $0x8] sm:$0xff] %v222_v49  }
 0x100   :  { %218 = vst [vmem:[%s293_s3] sm:$0xff] %v217_v50  }

// kernel: reformer_autoregressive_forward.16
= control target key start
LH: loop header
LB: loop body
LE: loop exit
PB: predicated region body
PF: predicated region fallthrough
CT: control target
= control target key end

     0   :  { %vm19_vm0 = vcmask 261120   ;;  %v269_v1 = vmov 0.0   ;;  %vm200_vm1 = vcmask 257024   ;;  %s343_s1 = inlined_call_operand.vmem [shape: bf16[128,32], index: 1, kind: input, shape index: {}]   ;;  %s344_s0 = inlined_call_operand.vmem [shape: bf16[32,128], index: 0, kind: input, shape index: {}]   ;;  %s345_s2 = inlined_call_operand.vmem [shape: f32[1,32], index: 2, kind: input, shape index: {}]   ;;  %s346_s3 = inlined_call_operand.vmem [shape: bf16[32,32], index: 3, kind: output, shape index: {}]  }
   0x1   :  { %v259_v0 = vld [vmem:[%s343_s1] sm:$0xff]   ;;  %22 = vst.msk [vmem:[#allocation2 + $0x10] sm:$0xff] %vm19_vm0, %v269_v1  ;;  %20 = vst.msk [vmem:[#allocation2] sm:$0xff] %vm19_vm0, %v269_v1  ;;  %v260_v2 = vld [vmem:[%s343_s1 + $0x8] sm:$0xff]  }
   0x2   :  { %21 = vst.msk [vmem:[#allocation2 + $0x8] sm:$0xff] %vm19_vm0, %v269_v1  ;;  %23 = vst.msk [vmem:[#allocation2 + $0x18] sm:$0xff] %vm19_vm0, %v269_v1  ;;  %238 = vmatprep.subr.bf16.mxu0 %v259_v0  ;;  %v261_v3 = vld [vmem:[%s343_s1 + $0x10] sm:$0xff]   ;;  %v262_v4 = vld [vmem:[%s343_s1 + $0x18] sm:$0xff]  }
   0x3   :  { %239 = vmatpush3.bf16.msra.mxu0 %v259_v0  ;;  %v267_v5 = vld [vmem:[%s344_s0] sm:$0xff]   ;;  %v264_v7 = vld [vmem:[%s343_s1 + $0x28] sm:$0xff]   ;;  %v265_v8 = vld [vmem:[%s343_s1 + $0x30] sm:$0xff]  }
   0x4   :  { %240 = vmatprep.subr.bf16.mxu0 %v260_v2  ;;  %254 = vmatprep.mubr.bf16.mxu0 %v267_v5  ;;  %v263_v6 = vld [vmem:[%s343_s1 + $0x20] sm:$0xff]   ;;  %v266_v9 = vld [vmem:[%s343_s1 + $0x38] sm:$0xff]   ;;  %v268_v10 = vld [vmem:[%s344_s0 + $0x8] sm:$0xff]  }
   0x5   :  { %v219_v23 = vld [vmem:[%s345_s2] ss:$0 sm:$0xff] }
   0x7   :  { %241 = vmatpush3.bf16.msra.mxu0 %v260_v2 }
   0x8   :  { %242 = vmatprep.subr.bf16.mxu0 %v261_v3  ;;  %v26_v11 = vld [vmem:[#allocation2 + $0x10] sm:$0xff]  ;;  %v24_v12 = vld [vmem:[#allocation2] sm:$0xff] }
   0x9   :  { %v27_v14 = vld [vmem:[#allocation2 + $0x18] sm:$0xff]  ;;  %v25_v17 = vld [vmem:[#allocation2 + $0x8] sm:$0xff] }
   0xb   :  { %243 = vmatpush3.bf16.msra.mxu0 %v261_v3 }
   0xc   :  { %244 = vmatprep.subr.bf16.mxu0 %v262_v4 }
   0xf   :  { %245 = vmatpush3.bf16.msra.mxu0 %v262_v4 }
  0x10   :  { %246 = vmatprep.subr.bf16.mxu0 %v263_v6 }
  0x13   :  { %247 = vmatpush3.bf16.msra.mxu0 %v263_v6 }
  0x14   :  { %248 = vmatprep.subr.bf16.mxu0 %v264_v7 }
  0x17   :  { %249 = vmatpush3.bf16.msra.mxu0 %v264_v7 }
  0x18   :  { %250 = vmatprep.subr.bf16.mxu0 %v265_v8 }
  0x1b   :  { %251 = vmatpush3.bf16.msra.mxu0 %v265_v8 }
  0x1c   :  { %252 = vmatprep.subr.bf16.mxu0 %v266_v9 }
  0x1f   :  { %253 = vmatpush3.bf16.msra.mxu0 %v266_v9 }
  0x22   :  { %255 = vmatmul.mubr.bf16.vlgmr.msra.gmra.mrb[0].mxu0 %v268_v10 }
  0xf5   :  { %v256_v13 = vpop.f32.mrb[0].mxu0 }
  0xf6   :  { %v159_v15 = vadd.f32 %v256_v13, %v26_v11  ;;  %v142_v16 = vpop.f32.mrb[1].mxu0 }
  0xf7   :  { %v157_v18 = vadd.f32 %v142_v16, %v24_v12  ;;  %v257_v19 = vpop.f32.mrb[2].mxu0 }
  0xf8   :  { %164 = vst.msk [vmem:[#allocation2 + $0x10] sm:$0xff] %vm19_vm0, %v159_v15  ;;  %v160_v20 = vadd.f32 %v257_v19, %v27_v14  ;;  %v145_v21 = vpop.f32.mrb[3].mxu0 }
  0xf9   :  { %162 = vst.msk [vmem:[#allocation2] sm:$0xff] %vm19_vm0, %v157_v18  ;;  %v158_v22 = vadd.f32 %v145_v21, %v25_v17 }
  0xfa   :  { %165 = vst.msk [vmem:[#allocation2 + $0x18] sm:$0xff] %vm19_vm0, %v160_v20 }
  0xfb   :  { %163 = vst.msk [vmem:[#allocation2 + $0x8] sm:$0xff] %vm19_vm0, %v158_v22 }
  0xff   :  { %v171_v24 = vld [vmem:[#allocation2 + $0x10] sm:$0xff] }
 0x100   :  { %v182_v25 = vadd.f32 %v219_v23, %v171_v24  ;;  %v169_v26 = vld [vmem:[#allocation2] sm:$0xff] }
 0x101   :  { %v180_v27 = vadd.f32 %v219_v23, %v169_v26  ;;  %v172_v28 = vld [vmem:[#allocation2 + $0x18] sm:$0xff] }
 0x102   :  { %v226_v29 = vpack.c.bf16 %v182_v25, %v182_v25  ;;  %v183_v30 = vadd.f32 %v219_v23, %v172_v28  ;;  %v170_v31 = vld [vmem:[#allocation2 + $0x8] sm:$0xff] }
 0x103   :  { %v224_v32 = vpack.c.bf16 %v180_v27, %v180_v27  ;;  %v181_v33 = vadd.f32 %v219_v23, %v170_v31 }
 0x104   :  { %203 = vst.msk [vmem:[%s346_s3 + $0x8] sm:$0xf] %vm200_vm1, %v226_v29  ;;  %v227_v34 = vpack.c.bf16 %v183_v30, %v183_v30 }
 0x105   :  { %201 = vst.msk [vmem:[%s346_s3] sm:$0xf] %vm200_vm1, %v224_v32  ;;  %v225_v35 = vpack.c.bf16 %v181_v33, %v181_v33 }
 0x106   :  { %204 = vst.msk [vmem:[%s346_s3 + $0xc] sm:$0xf] %vm200_vm1, %v227_v34 }
 0x107   :  { %202 = vst.msk [vmem:[%s346_s3 + $0x4] sm:$0xf] %vm200_vm1, %v225_v35 }

// kernel: reformer_autoregressive_forward.22
= control target key start
LH: loop header
LB: loop body
LE: loop exit
PB: predicated region body
PF: predicated region fallthrough
CT: control target
= control target key end

     0   :  { %vm19_vm0 = vcmask 523264   ;;  %v173_v1 = vmov 0.0   ;;  %vm58_vm1 = vcmask 261120   ;;  %s233_s1 = inlined_call_operand.vmem [shape: bf16[32,64], index: 1, kind: input, shape index: {}]   ;;  %s234_s0 = inlined_call_operand.vmem [shape: bf16[32,32], index: 0, kind: input, shape index: {}]   ;;  %s235_s2 = inlined_call_operand.vmem [shape: f32[1,64], index: 2, kind: input, shape index: {}]   ;;  %s236_s3 = inlined_call_operand.vmem [shape: f32[32,64], index: 3, kind: output, shape index: {}]  }
   0x1   :  { %v169_v0 = vld [vmem:[%s233_s1] sm:$0xff]   ;;  %22 = vst.msk [vmem:[#allocation2 + $0x10] sm:$0xff] %vm19_vm0, %v173_v1  ;;  %20 = vst.msk [vmem:[#allocation2] sm:$0xff] %vm19_vm0, %v173_v1  ;;  %v170_v2 = vld [vmem:[%s233_s1 + $0x8] sm:$0xff]  }
   0x2   :  { %21 = vst.msk [vmem:[#allocation2 + $0x8] sm:$0xff] %vm19_vm0, %v173_v1  ;;  %23 = vst.msk [vmem:[#allocation2 + $0x18] sm:$0xff] %vm19_vm0, %v173_v1  ;;  %160 = vmatprep.subr.bf16.mxu0 %v169_v0  ;;  %v171_v3 = vld [vmem:[%s234_s0] sm:$0xff]   ;;  %v172_v4 = vld [vmem:[%s234_s0 + $0x8] sm:$0xff]  }
   0x3   :  { %161 = vmatpush3.bf16.msra.mxu0 %v169_v0  ;;  %164 = vmatprep.mubr.msk.bf16.mxu0 %vm58_vm1, %v171_v3  ;;  %v155_v17 = vld [vmem:[%s235_s2] ss:$0 sm:$0xff] }
   0x4   :  { %162 = vmatprep.subr.bf16.mxu0 %v170_v2 }
   0x7   :  { %163 = vmatpush3.bf16.msra.mxu0 %v170_v2 }
   0x8   :  { %v26_v5 = vld [vmem:[#allocation2 + $0x10] sm:$0xff]  ;;  %v24_v6 = vld [vmem:[#allocation2] sm:$0xff] }
   0x9   :  { %v27_v8 = vld [vmem:[#allocation2 + $0x18] sm:$0xff]  ;;  %v25_v11 = vld [vmem:[#allocation2 + $0x8] sm:$0xff] }
   0xa   :  { %165 = vmatmul.mubr.msk.bf16.vlgmr.msra.gmra.mrb[0].mxu0 %vm58_vm1, %v172_v4 }
  0xdd   :  { %v166_v7 = vpop.f32.mrb[0].mxu0 }
  0xde   :  { %v116_v9 = vadd.f32 %v166_v7, %v26_v5  ;;  %v99_v10 = vpop.f32.mrb[1].mxu0 }
  0xdf   :  { %v114_v12 = vadd.f32 %v99_v10, %v24_v6  ;;  %v167_v13 = vpop.f32.mrb[2].mxu0 }
  0xe0   :  { %121 = vst.msk [vmem:[#allocation2 + $0x10] sm:$0xff] %vm19_vm0, %v116_v9  ;;  %v117_v14 = vadd.f32 %v167_v13, %v27_v8  ;;  %v102_v15 = vpop.f32.mrb[3].mxu0 }
  0xe1   :  { %119 = vst.msk [vmem:[#allocation2] sm:$0xff] %vm19_vm0, %v114_v12  ;;  %v115_v16 = vadd.f32 %v102_v15, %v25_v11 }
  0xe2   :  { %122 = vst.msk [vmem:[#allocation2 + $0x18] sm:$0xff] %vm19_vm0, %v117_v14 }
  0xe3   :  { %120 = vst.msk [vmem:[#allocation2 + $0x8] sm:$0xff] %vm19_vm0, %v115_v16 }
  0xe7   :  { %v128_v18 = vld [vmem:[#allocation2 + $0x10] sm:$0xff] }
  0xe8   :  { %v139_v19 = vadd.f32 %v155_v17, %v128_v18  ;;  %v126_v20 = vld [vmem:[#allocation2] sm:$0xff] }
  0xe9   :  { %v137_v21 = vadd.f32 %v155_v17, %v126_v20  ;;  %v129_v22 = vld [vmem:[#allocation2 + $0x18] sm:$0xff] }
  0xea   :  { %143 = vst.msk [vmem:[%s236_s3 + $0x10] sm:$0xff] %vm19_vm0, %v139_v19  ;;  %v140_v23 = vadd.f32 %v155_v17, %v129_v22  ;;  %v127_v24 = vld [vmem:[#allocation2 + $0x8] sm:$0xff] }
  0xeb   :  { %141 = vst.msk [vmem:[%s236_s3] sm:$0xff] %vm19_vm0, %v137_v21  ;;  %v138_v25 = vadd.f32 %v155_v17, %v127_v24 }
  0xec   :  { %144 = vst.msk [vmem:[%s236_s3 + $0x18] sm:$0xff] %vm19_vm0, %v140_v23 }
  0xed   :  { %142 = vst.msk [vmem:[%s236_s3 + $0x8] sm:$0xff] %vm19_vm0, %v138_v25 }

// kernel: reformer_autoregressive_forward.23
= control target key start
LH: loop header
LB: loop body
LE: loop exit
PB: predicated region body
PF: predicated region fallthrough
CT: control target
= control target key end

     0   :  { %9 = vsyncpa [#allocation3], 0  ;;  %vm30_vm0 = vcmask 523264   ;;  %v281_v6 = vmov 0   ;;  %s423_s0 = inlined_call_operand.vmem [shape: f32[32,64], index: 0, kind: input, shape index: {}]   ;;  %s424_s1 = inlined_call_operand.vmem [shape: s32[32,1], index: 1, kind: input, shape index: {}]   ;;  %s425_s2 = inlined_call_operand.hbm [shape: f32[1,1], index: 2, kind: output, shape index: {0}]   ;;  %s426_s3 = inlined_call_operand.hbm [shape: f32[1,1], index: 3, kind: output, shape index: {1}]  }
   0x1   :  { %v22_v0 = vld [vmem:[%s423_s0] sm:$0xff]  ;;  %v24_v1 = vld [vmem:[%s423_s0 + $0x10] sm:$0xff]  ;;  %v314_v2 = vld [vmem:[%s423_s0 + $0x8] sm:$0xff]  ;;  %216 = vset.pattern.permute.xlu1 %v281_v6  ;;  %215 = vset.pattern.permute.xlu0 %v281_v6 }
   0x2   :  { %v31_v3 = vsel %vm30_vm0, %v22_v0, -inf  ;;  %v37_v4 = vsel %vm30_vm0, %v24_v1, -inf  ;;  %v321_v5 = vld [vmem:[%s423_s0 + $0x18] sm:$0xff]  ;;  %v34_v7 = vsel %vm30_vm0, %v314_v2, -inf }
   0x3   :  { %32 = vmax.xlane.f32.xlu0 %v31_v3  ;;  %38 = vmax.xlane.f32.xlu1 %v37_v4  ;;  %v40_v8 = vsel %vm30_vm0, %v321_v5, -inf }
   0x4   :  { %10 = vsyncpa [#allocation5], 0  ;;  %v330_v9 = vld [vmem:[%s424_s1 + $0x8] sm:$0xff]  ;;  %v336_v10 = vld [vmem:[%s424_s1 + $0x10] sm:$0xff]  ;;  %v79_v26 = vlaneseq  ;;  %vm134_vm8 = vcmask 7168   ;;  %v282_v47 = vmov 0.0  }
   0x5   :  { %v26_v11 = vld [vmem:[%s424_s1] sm:$0xff]  ;;  %v345_v12 = vld [vmem:[%s424_s1 + $0x18] sm:$0xff]  ;;  %vm114_vm5 = vcmp.ne.s32.totalorder %v330_v9, 0  ;;  %vm115_vm7 = vcmp.ne.s32.totalorder %v336_v10, 0  ;;  %vm19_vm10 = vcmask 0   ;;  %s283_s1 = smov [#allocation2]  }
   0x6   :  { %v80_v27 = vand.u32 127, %v79_v26  ;;  %vm113_vm6 = vcmp.ne.s32.totalorder %v26_v11, 0  ;;  %v204_v49 = vsel %vm114_vm5, 1.0, %v282_v47  ;;  %vm116_vm9 = vcmp.ne.s32.totalorder %v345_v12, 0  ;;  %20 = vst.msk [vmem:[#allocation2] sm:$0x1] %vm19_vm10, %v282_v47 }
   0x7   :  { %35 = vmax.xlane.f32.xlu0 %v34_v7  ;;  %41 = vmax.xlane.f32.xlu1 %v40_v8  ;;  %v203_v48 = vsel %vm113_vm6, 1.0, %v282_v47  ;;  %v157_v51 = vsel %vm134_vm8, %v204_v49, 0.0  ;;  %v205_v52 = vsel %vm115_vm7, 1.0, %v282_v47  ;;  %v206_v55 = vsel %vm116_vm9, 1.0, %v282_v47  ;;  %21 = vst.msk [vmem:[#allocation4] sm:$0x1] %vm19_vm10, %v282_v47 }
   0x8   :  { %v156_v50 = vsel %vm134_vm8, %v203_v48, 0.0  ;;  %v159_v54 = vsel %vm134_vm8, %v205_v52, 0.0  ;;  %v161_v57 = vsel %vm134_vm8, %v206_v55, 0.0  ;;  %s181_s27 = sshll.u32 %s283_s1, 4  ;;  %s284_s29 = smov [#allocation4]   ;;  %s182_s27 = int_to_ptr.vmem [resolvable:$true] %s181_s27 }
   0x9   :  { %v158_v53 = vadd.f32 %v157_v51, %v156_v50  ;;  %s191_s30 = sshll.u32 %s284_s29, 4  ;;  %s233_s5 = scalar_lea.vmem %s182_s27, 16  ;;  %s389_s30 = int_to_ptr.vmem [resolvable:$true] %s191_s30 }
   0xa   :  { %p234_p0 = scmp.ne.s32.totalorder %s182_s27, %s233_s5  ;;  %s237_s6 = scalar_lea.vmem %s182_s27, 32 }
   0xb   :  { %v160_v56 = vadd.f32 %v159_v54, %v158_v53  ;;  %p238_p1 = scmp.lt.s32.totalorder %s182_s27, %s182_s27  ;;  %p239_p2 = scmp.lt.s32.totalorder %s237_s6, %s233_s5 }
   0xd   :  { %v162_v58 = vadd.f32 %v161_v57, %v160_v56  ;;  %p240_p3 = por %p239_p2, %p238_p1 }
   0xf   :  { %p241_p4 = pnand %p240_p3, %p234_p0 }
  0x18   :  { %85 = vperm.xlu1 %216, %v330_v9  }
  0x1c   :  { %88 = vperm.xlu1 %216, %v336_v10  }
  0x1d   :  { %82 = vperm.xlu0 %215, %v26_v11  }
  0x20   :  { %91 = vperm.xlu1 %216, %v345_v12  }
  0x90   :  { %v348_v13 = vpop.xlane.xlu0 %32  ;;  %v350_v14 = vpop.xlane.xlu1 %38 }
  0x91   :  { %v43_v15 = vsub.f32 %v22_v0, %v348_v13  ;;  %v45_v16 = vsub.f32 %v24_v1, %v350_v14 }
  0x93   :  { %v47_v17 = vmul.f32 1.442695, %v43_v15  ;;  %v51_v18 = vmul.f32 1.442695, %v45_v16 }
  0x94   :  { %v354_v19 = vpop.xlane.xlu0 %35  ;;  %v356_v20 = vpop.xlane.xlu1 %41 }
  0x95   :  { %217 = vpow2.f32 %v47_v17  ;;  %v44_v21 = vsub.f32 %v314_v2, %v354_v19  ;;  %v46_v22 = vsub.f32 %v321_v5, %v356_v20 }
  0x96   :  { %219 = vpow2.f32 %v51_v18 }
  0x97   :  { %v49_v23 = vmul.f32 1.442695, %v44_v21  ;;  %v53_v24 = vmul.f32 1.442695, %v46_v22 }
  0x98   :  { %v86_v25 = vpop.permute.xlu1 %85 }
  0x99   :  { %221 = vpow2.f32 %v49_v23  ;;  %vm94_vm3 = vcmp.eq.s32.totalorder %v80_v27, %v86_v25 }
  0x9a   :  { %223 = vpow2.f32 %v53_v24  ;;  %v98_v43 = vsel %vm94_vm3, %v314_v2, 0.0 }
  0x9b   :  { %v104_v44 = vsel %vm30_vm0, %v98_v43, 0.0 }
  0x9c   :  { %v89_v29 = vpop.permute.xlu1 %88  ;;  %v83_v32 = vpop.permute.xlu0 %82 }
  0x9d   :  { %vm95_vm1 = vcmp.eq.s32.totalorder %v80_v27, %v89_v29  ;;  %vm93_vm2 = vcmp.eq.s32.totalorder %v80_v27, %v83_v32 }
  0x9e   :  { %v99_v35 = vsel %vm95_vm1, %v24_v1, 0.0  ;;  %v97_v40 = vsel %vm93_vm2, %v22_v0, 0.0 }
  0x9f   :  { %v218_v28 = vpop.eup %217  ;;  %v107_v39 = vsel %vm30_vm0, %v99_v35, 0.0  ;;  %v101_v41 = vsel %vm30_vm0, %v97_v40, 0.0 }
  0xa0   :  { %v220_v30 = vpop.eup %219  ;;  %v55_v31 = vsel %vm30_vm0, %v218_v28, 0.0  ;;  %v92_v42 = vpop.permute.xlu1 %91 }
  0xa1   :  { %56 = vadd.xlane.f32.xlu1 %v55_v31  ;;  %v61_v33 = vsel %vm30_vm0, %v220_v30, 0.0  ;;  %vm96_vm4 = vcmp.eq.s32.totalorder %v80_v27, %v92_v42 }
  0xa2   :  { %v100_v45 = vsel %vm96_vm4, %v321_v5, 0.0 }
  0xa3   :  { %v222_v34 = vpop.eup %221  ;;  %v110_v46 = vsel %vm30_vm0, %v100_v45, 0.0  ;;  %v155_v45 = vld [vmem:[#allocation4] sm:$0x1] }
  0xa4   :  { %v224_v36 = vpop.eup %223  ;;  %v58_v37 = vsel %vm30_vm0, %v222_v34, 0.0 }
  0xa5   :  { %62 = vadd.xlane.f32.xlu1 %v61_v33  ;;  %59 = vadd.xlane.f32.xlu0 %v58_v37  ;;  %v64_v38 = vsel %vm30_vm0, %v224_v36, 0.0 }
  0xa9   :  { %65 = vadd.xlane.f32.xlu1 %v64_v38  ;;  %108 = vadd.xlane.f32.xlu0 %v107_v39 }
  0xad   :  { %102 = vadd.xlane.f32.xlu1 %v101_v41 }
  0xb1   :  { %105 = vadd.xlane.f32.xlu1 %v104_v44  ;;  %v125_v44 = vld [vmem:[#allocation2] sm:$0x1] }
  0xb5   :  { %111 = vadd.xlane.f32.xlu1 %v110_v46 }
  0xb9   :  { %163 = vadd.xlane.f32.xlu1 %v162_v58 }
 0x12e   :  { %v57_v59 = vpop.xlane.xlu1 %56 }
 0x12f   :  { %225 = vlog2.f32 %v57_v59 }
 0x132   :  { %v63_v60 = vpop.xlane.xlu1 %62  ;;  %v60_v61 = vpop.xlane.xlu0 %59 }
 0x133   :  { %227 = vlog2.f32 %v63_v60 }
 0x134   :  { %229 = vlog2.f32 %v60_v61 }
 0x136   :  { %v66_v62 = vpop.xlane.xlu1 %65  ;;  %v109_v11 = vpop.xlane.xlu0 %108 }
 0x137   :  { %231 = vlog2.f32 %v66_v62 }
 0x139   :  { %v226_v63 = vpop.eup %225 }
 0x13a   :  { %v68_v0 = vmul.f32 0.6931472, %v226_v63  ;;  %v103_v1 = vpop.xlane.xlu1 %102 }
 0x13c   :  { %v75_v2 = vadd.f32 %v68_v0, %v348_v13 }
 0x13d   :  { %v228_v3 = vpop.eup %227 }
 0x13e   :  { %v230_v4 = vpop.eup %229  ;;  %v72_v5 = vmul.f32 0.6931472, %v228_v3  ;;  %v126_v7 = vsub.f32 %v75_v2, %v103_v1  ;;  %v106_v8 = vpop.xlane.xlu1 %105 }
 0x13f   :  { %v70_v6 = vmul.f32 0.6931472, %v230_v4 }
 0x140   :  { %v77_v9 = vadd.f32 %v72_v5, %v350_v14  ;;  %v130_v17 = vmul.f32 %v203_v48, %v126_v7 }
 0x141   :  { %v232_v10 = vpop.eup %231  ;;  %v76_v12 = vadd.f32 %v70_v6, %v354_v19 }
 0x142   :  { %v74_v15 = vmul.f32 0.6931472, %v232_v10  ;;  %v128_v16 = vsub.f32 %v77_v9, %v109_v11  ;;  %v112_v23 = vpop.xlane.xlu1 %111  ;;  %v135_v25 = vsel %vm134_vm8, %v130_v17, 0.0 }
 0x143   :  { %v127_v18 = vsub.f32 %v76_v12, %v106_v8 }
 0x144   :  { %v78_v21 = vadd.f32 %v74_v15, %v356_v20  ;;  %v132_v22 = vmul.f32 %v205_v52, %v128_v16 }
 0x145   :  { %v131_v13 = vmul.f32 %v204_v49, %v127_v18 }
 0x146   :  { %v129_v24 = vsub.f32 %v78_v21, %v112_v23  ;;  %v138_v28 = vsel %vm134_vm8, %v132_v22, 0.0  ;;  %v164_v20 = vpop.xlane.xlu1 %163 }
 0x147   :  { %v136_v26 = vsel %vm134_vm8, %v131_v13, 0.0  ;;  %v165_v31 = vrot.slane %v164_v20, 4 }
 0x148   :  { %v133_v27 = vmul.f32 %v206_v55, %v129_v24  ;;  %v137_v14 = vadd.f32 %v136_v26, %v135_v25 }
 0x149   :  { %v166_v32 = vadd.f32 %v165_v31, %v164_v20 }
 0x14a   :  { %v139_v29 = vadd.f32 %v138_v28, %v137_v14  ;;  %v140_v19 = vsel %vm134_vm8, %v133_v27, 0.0 }
 0x14b   :  { %v167_v33 = vrot.slane %v166_v32, 2 }
 0x14c   :  { %v141_v30 = vadd.f32 %v140_v19, %v139_v29 }
 0x14d   :  { %v168_v37 = vadd.f32 %v167_v33, %v166_v32 }
 0x14e   :  { %142 = vadd.xlane.f32.xlu0 %v141_v30 }
 0x14f   :  { %v169_v40 = vrot.slane %v168_v37, 1 }
 0x151   :  { %v170_v43 = vadd.f32 %v169_v40, %v168_v37 }
 0x1db   :  { %v143_v34 = vpop.xlane.xlu0 %142 }
 0x1dc   :  { %v144_v35 = vrot.slane %v143_v34, 4 }
 0x1de   :  { %v145_v36 = vadd.f32 %v144_v35, %v143_v34 }
 0x1e0   :  { %v146_v38 = vrot.slane %v145_v36, 2 }
 0x1e2   :  { %v147_v39 = vadd.f32 %v146_v38, %v145_v36 }
 0x1e4   :  { %v148_v41 = vrot.slane %v147_v39, 1 }
 0x1e6   :  { %v149_v42 = vadd.f32 %v148_v41, %v147_v39 }
 0x1e8   :  { %207 = vpush %v149_v42 }
 0x1e9   :  { %209 = vpush %v170_v43 }
 0x219   :  { %s208_s28 = spop %207 }
 0x21a   :  { %v151_v46 = vstv %s208_s28  ;;  %s210_s4 = spop %209 }
 0x21b   :  { %v152_v47 = vadd.f32 %v151_v46, %v125_v44  ;;  %v172_v48 = vstv %s210_s4 }
 0x21c   :  { %v173_v49 = vadd.f32 %v172_v48, %v155_v45 }
 0x21d   :  { %154 = vst.msk [vmem:[#allocation2] sm:$0x1] %vm19_vm10, %v152_v47 }
 0x21e   :  { %174 = vst.msk [vmem:[#allocation4] sm:$0x1] %vm19_vm10, %v173_v49 }
 0x21f   :  { %244 = shalt.err (!%p241_p4)
}
 0x220   :  { %s245_s9 = scalar_lea.hbm %s425_s2, 16 }
 0x221   :  { %p246_p5 = scmp.ne.s32.totalorder %s425_s2, %s245_s9  ;;  %p249_p6 = scmp.lt.u32.totalorder %s245_s9, %s425_s2 }
 0x223   :  { %p251_p7 = pnand %p249_p6, %p246_p5 }
 0x225   :  { %254 = shalt.err (!%p251_p7)
}
 0x226   :  { %184 = dma.vmem_to_hbm [thread:$0]  %s182_s27, 16, %s425_s2, [#allocation3]  }
 0x227   :  { %s255_s16 = scalar_lea.vmem %s389_s30, 16  ;;  %s259_s17 = scalar_lea.vmem %s389_s30, 32 }
 0x228   :  { %p256_p8 = scmp.ne.s32.totalorder %s389_s30, %s255_s16  ;;  %p260_p9 = scmp.lt.s32.totalorder %s389_s30, %s389_s30 }
 0x229   :  { %p261_p10 = scmp.lt.s32.totalorder %s259_s17, %s255_s16 }
 0x22b   :  { %p262_p11 = por %p261_p10, %p260_p9 }
 0x22d   :  { %p263_p12 = pnand %p262_p11, %p256_p8 }
 0x22f   :  { %266 = shalt.err (!%p263_p12)
}
 0x230   :  { %s267_s20 = scalar_lea.hbm %s426_s3, 16 }
 0x231   :  { %p268_p13 = scmp.ne.s32.totalorder %s426_s3, %s267_s20  ;;  %p271_p0 = scmp.lt.u32.totalorder %s267_s20, %s426_s3 }
 0x233   :  { %p273_p1 = pnand %p271_p0, %p268_p13 }
 0x235   :  { %276 = shalt.err (!%p273_p1)
}
 0x236   :  { %194 = dma.vmem_to_hbm [thread:$0]  %s389_s30, 16, %s426_s3, [#allocation5]  }
 0x237   :  { %277 = dma.done.wait [#allocation3], 16  }
 0x238   :  { %278 = vsyncadd [#allocation3], 4294967280 }
 0x239   :  { %279 = dma.done.wait [#allocation5], 16  }
 0x23a   :  { %280 = vsyncadd [#allocation5], 4294967280 }
 0x23b   :  { %201 = vsyncpa [#allocation3], 1 }
 0x23c   :  { %202 = vsyncpa [#allocation5], 1 }

</bundles_post_ra>
